<compile_context>
chip_gen: v7x
topology: tpu7x:2x2x1
jax: 0.10.0
libtpu: 0.0.40
codegen_flags: <defaults>
</compile_context>

<pallas_src>
import functools

import jax
import jax.numpy as jnp
from jax.experimental import pallas as pl
from jax.experimental.pallas import tpu as pltpu


def _round_up(n, m):
    return ((n + m - 1) // m) * m


def _fuzzy_kernel(x_ref, miuT_ref, nscale2T_ref, outT_ref, *, exp_dtype):
    # x_ref:        (TB, D)  natural-layout batch tile of x
    # miuT_ref:     (D, M)   membership centers, transposed (grid-invariant)
    # nscale2T_ref: (D, M)   -0.5 / sigma**2, transposed (grid-invariant)
    # outT_ref:     (M, TB)  lane-dense output tile (transposed back in wrapper)

    # One in-kernel transpose puts the batch tile on the 128-lane axis and the
    # feature dim on sublanes; rides the XLU slot (slack under EUP-bound body).
    xT = jnp.transpose(x_ref[...])                        # (D, TB)

    miuT = miuT_ref[...]                                  # (D, M)
    ns2T = nscale2T_ref[...]                              # (D, M)
    D, M = miuT.shape

    rows = []
    # Statically unrolled loop over membership rows: per-iteration live set is
    # one (D, TB) tile; no (M, D, TB) temporaries are materialized in VMEM.
    for m in range(M):
        diff = xT - miuT[:, m:m + 1]                      # (D, TB)
        z = diff * diff * ns2T[:, m:m + 1]                # == -0.5*((x-miu)/sigma)^2
        if exp_dtype == jnp.float32:
            memb = jnp.exp(z)
        else:
            # Opt-in reduced-precision exp (v6e/v7x): ~2x EUP throughput,
            # ~1e-2 relative error per term; accumulate in f32.
            memb = jnp.exp(z.astype(exp_dtype)).astype(jnp.float32)
        rows.append(jnp.sum(memb, axis=0, keepdims=True))  # (1, TB) sublane reduce

    out = jnp.concatenate(rows, axis=0) * (1.0 / D)        # mean over D, (M, TB)
    outT_ref[...] = out.astype(outT_ref.dtype)


def fuzzy_layer(x, miu, sigma, *, batch_tile=512, use_bf16_exp=False):
    B, D = x.shape
    M, D2 = miu.shape
    assert D == D2 and sigma.shape == (M, D)

    x = x.astype(jnp.float32)
    # Hoist the divide AND the -0.5 sign out of the per-element hot path:
    #   exp(-0.5*((x-miu)/sigma)^2) == exp((x-miu)^2 * nscale2)
    nscale2 = -0.5 / (sigma.astype(jnp.float32) ** 2)
    miuT = miu.astype(jnp.float32).T                       # (D, M), tiny
    nscale2T = nscale2.T                                   # (D, M), tiny

    # Batch tile: lane-dense (multiple of 128); >= 2 grid steps whenever
    # B > 128 so the "parallel" axis shards across both v7x TensorCores, with
    # padding bounded by sizing the tile from ceil(B / n_steps).
    if B <= 128:
        tb = 128
    else:
        n_steps = max(2, pl.cdiv(B, batch_tile))
        tb = _round_up(pl.cdiv(B, n_steps), 128)
    b_pad = _round_up(B, tb)
    grid = (b_pad // tb,)

    if b_pad != B:
        # Padded rows compute garbage memberships and are sliced off below.
        x = jnp.pad(x, ((0, b_pad - B), (0, 0)))

    cost = pl.CostEstimate(
        flops=4 * b_pad * M * D,
        transcendentals=b_pad * M * D,
        bytes_accessed=4 * (b_pad * D + 2 * M * D + M * b_pad),
    )

    kernel = functools.partial(
        _fuzzy_kernel,
        exp_dtype=jnp.bfloat16 if use_bf16_exp else jnp.float32,
    )

    outT = pl.pallas_call(
        kernel,
        out_shape=jax.ShapeDtypeStruct((M, b_pad), x.dtype),
        grid_spec=pltpu.PrefetchScalarGridSpec(
            num_scalar_prefetch=0,
            grid=grid,
            in_specs=[
                pl.BlockSpec((tb, D), lambda i: (i, 0)),   # natural x tile
                pl.BlockSpec((D, M), lambda i: (0, 0)),    # miu^T (grid-invariant)
                pl.BlockSpec((D, M), lambda i: (0, 0)),    # -0.5/sigma^2 ^T (grid-invariant)
            ],
            out_specs=pl.BlockSpec((M, tb), lambda i: (0, i)),  # lane-dense output
        ),
        compiler_params=pltpu.CompilerParams(
            dimension_semantics=("parallel",),
        ),
        cost_estimate=cost,
    )(x, miuT, nscale2T)

    # Drop batch padding; the (M, B) -> (B, M) transpose is tiny (M = 16 rows).
    return outT[:, :B].T


def fuzzy_layer_ref(x, miu, sigma):
    diff = x[:, None, :] - miu[None, :, :]
    z = diff / sigma[None, :, :]
    return jnp.mean(jnp.exp(-0.5 * z * z), axis=-1)


if __name__ == "__main__":
    # Shapes consistent with the module: input_dim = 6 * metadata_each_dim = 60.
    metadata_each_dim = 10
    input_dim = 6 * metadata_each_dim     # 60
    membership_num = 16
    batch = 32

    key = jax.random.PRNGKey(0)
    k_x, k_miu = jax.random.split(key)

    x = jax.random.normal(k_x, (batch, input_dim), dtype=jnp.float32)

    # Deterministic parameter init matching the module's __init__:
    #   nn.init.xavier_uniform_(miu): U(-a, a), a = sqrt(6 / (fan_in + fan_out))
    bound = (6.0 / (input_dim + membership_num)) ** 0.5
    miu = jax.random.uniform(
        k_miu, (membership_num, input_dim), dtype=jnp.float32,
        minval=-bound, maxval=bound)
    #   nn.init.ones_(sigma)
    sigma = jnp.ones((membership_num, input_dim), dtype=jnp.float32)

    out = fuzzy_layer(x, miu, sigma)
    out = jax.block_until_ready(out)

    expected = fuzzy_layer_ref(x, miu, sigma)
    assert out.shape == (batch, membership_num)
    assert jnp.allclose(out, expected, atol=1e-5, rtol=1e-5), "mismatch vs reference"

    print("KERNEL_OK")
</pallas_src>

<mosaic_0001>
module attributes {stable_mosaic.version = 11 : i64} {
  func.func @_fuzzy_kernel(%arg0: i32, %arg1: memref<128x60xf32, #tpu.memory_space<vmem>>, %arg2: memref<60x16xf32, #tpu.memory_space<vmem>>, %arg3: memref<60x16xf32, #tpu.memory_space<vmem>>, %arg4: memref<16x128xf32, #tpu.memory_space<vmem>>) attributes {dimension_semantics = [#tpu.dimension_semantics<parallel>], iteration_bounds = array<i64: 1>, scalar_prefetch = 0 : i64, scratch_operands = 0 : i64, tpu.core_type = #tpu.core_type<tc>, window_params = [{transform_indices = @transform_0, window_bounds = array<i64: 128, 60>}, {pipeline_mode = #tpu.pipeline_mode<synchronous>, transform_indices = @transform_1, window_bounds = array<i64: 60, 16>}, {pipeline_mode = #tpu.pipeline_mode<synchronous>, transform_indices = @transform_2, window_bounds = array<i64: 60, 16>}, {transform_indices = @transform_3, window_bounds = array<i64: 16, 128>}]} {
    %c0 = arith.constant 0 : index
    %c0_0 = arith.constant 0 : index
    %0 = vector.load %arg1[%c0, %c0_0] : memref<128x60xf32, #tpu.memory_space<vmem>>, vector<128x60xf32>
    %1 = tpu.transpose %0, [1, 0] : vector<128x60xf32> -> vector<60x128xf32>
    %c0_1 = arith.constant 0 : index
    %c0_2 = arith.constant 0 : index
    %2 = vector.load %arg2[%c0_1, %c0_2] : memref<60x16xf32, #tpu.memory_space<vmem>>, vector<60x16xf32>
    %c0_3 = arith.constant 0 : index
    %c0_4 = arith.constant 0 : index
    %3 = vector.load %arg3[%c0_3, %c0_4] : memref<60x16xf32, #tpu.memory_space<vmem>>, vector<60x16xf32>
    %4 = vector.extract_strided_slice %2 {offsets = [0, 0], sizes = [60, 1], strides = [1, 1]} : vector<60x16xf32> to vector<60x1xf32>
    %5 = vector.broadcast %4 : vector<60x1xf32> to vector<60x128xf32>
    %6 = arith.subf %1, %5 : vector<60x128xf32>
    %7 = arith.mulf %6, %6 : vector<60x128xf32>
    %8 = vector.extract_strided_slice %3 {offsets = [0, 0], sizes = [60, 1], strides = [1, 1]} : vector<60x16xf32> to vector<60x1xf32>
    %9 = vector.broadcast %8 : vector<60x1xf32> to vector<60x128xf32>
    %10 = arith.mulf %7, %9 : vector<60x128xf32>
    %11 = math.exp %10 : vector<60x128xf32>
    %cst = arith.constant dense<0.000000e+00> : vector<128xf32>
    %12 = vector.multi_reduction <add>, %11, %cst [0] : vector<60x128xf32> to vector<128xf32>
    %13 = vector.shape_cast %12 : vector<128xf32> to vector<1x128xf32>
    %14 = vector.extract_strided_slice %2 {offsets = [0, 1], sizes = [60, 1], strides = [1, 1]} : vector<60x16xf32> to vector<60x1xf32>
    %15 = vector.broadcast %14 : vector<60x1xf32> to vector<60x128xf32>
    %16 = arith.subf %1, %15 : vector<60x128xf32>
    %17 = arith.mulf %16, %16 : vector<60x128xf32>
    %18 = vector.extract_strided_slice %3 {offsets = [0, 1], sizes = [60, 1], strides = [1, 1]} : vector<60x16xf32> to vector<60x1xf32>
    %19 = vector.broadcast %18 : vector<60x1xf32> to vector<60x128xf32>
    %20 = arith.mulf %17, %19 : vector<60x128xf32>
    %21 = math.exp %20 : vector<60x128xf32>
    %cst_5 = arith.constant dense<0.000000e+00> : vector<128xf32>
    %22 = vector.multi_reduction <add>, %21, %cst_5 [0] : vector<60x128xf32> to vector<128xf32>
    %23 = vector.shape_cast %22 : vector<128xf32> to vector<1x128xf32>
    %24 = vector.extract_strided_slice %2 {offsets = [0, 2], sizes = [60, 1], strides = [1, 1]} : vector<60x16xf32> to vector<60x1xf32>
    %25 = vector.broadcast %24 : vector<60x1xf32> to vector<60x128xf32>
    %26 = arith.subf %1, %25 : vector<60x128xf32>
    %27 = arith.mulf %26, %26 : vector<60x128xf32>
    %28 = vector.extract_strided_slice %3 {offsets = [0, 2], sizes = [60, 1], strides = [1, 1]} : vector<60x16xf32> to vector<60x1xf32>
    %29 = vector.broadcast %28 : vector<60x1xf32> to vector<60x128xf32>
    %30 = arith.mulf %27, %29 : vector<60x128xf32>
    %31 = math.exp %30 : vector<60x128xf32>
    %cst_6 = arith.constant dense<0.000000e+00> : vector<128xf32>
    %32 = vector.multi_reduction <add>, %31, %cst_6 [0] : vector<60x128xf32> to vector<128xf32>
    %33 = vector.shape_cast %32 : vector<128xf32> to vector<1x128xf32>
    %34 = vector.extract_strided_slice %2 {offsets = [0, 3], sizes = [60, 1], strides = [1, 1]} : vector<60x16xf32> to vector<60x1xf32>
    %35 = vector.broadcast %34 : vector<60x1xf32> to vector<60x128xf32>
    %36 = arith.subf %1, %35 : vector<60x128xf32>
    %37 = arith.mulf %36, %36 : vector<60x128xf32>
    %38 = vector.extract_strided_slice %3 {offsets = [0, 3], sizes = [60, 1], strides = [1, 1]} : vector<60x16xf32> to vector<60x1xf32>
    %39 = vector.broadcast %38 : vector<60x1xf32> to vector<60x128xf32>
    %40 = arith.mulf %37, %39 : vector<60x128xf32>
    %41 = math.exp %40 : vector<60x128xf32>
    %cst_7 = arith.constant dense<0.000000e+00> : vector<128xf32>
    %42 = vector.multi_reduction <add>, %41, %cst_7 [0] : vector<60x128xf32> to vector<128xf32>
    %43 = vector.shape_cast %42 : vector<128xf32> to vector<1x128xf32>
    %44 = vector.extract_strided_slice %2 {offsets = [0, 4], sizes = [60, 1], strides = [1, 1]} : vector<60x16xf32> to vector<60x1xf32>
    %45 = vector.broadcast %44 : vector<60x1xf32> to vector<60x128xf32>
    %46 = arith.subf %1, %45 : vector<60x128xf32>
    %47 = arith.mulf %46, %46 : vector<60x128xf32>
    %48 = vector.extract_strided_slice %3 {offsets = [0, 4], sizes = [60, 1], strides = [1, 1]} : vector<60x16xf32> to vector<60x1xf32>
    %49 = vector.broadcast %48 : vector<60x1xf32> to vector<60x128xf32>
    %50 = arith.mulf %47, %49 : vector<60x128xf32>
    %51 = math.exp %50 : vector<60x128xf32>
    %cst_8 = arith.constant dense<0.000000e+00> : vector<128xf32>
    %52 = vector.multi_reduction <add>, %51, %cst_8 [0] : vector<60x128xf32> to vector<128xf32>
    %53 = vector.shape_cast %52 : vector<128xf32> to vector<1x128xf32>
    %54 = vector.extract_strided_slice %2 {offsets = [0, 5], sizes = [60, 1], strides = [1, 1]} : vector<60x16xf32> to vector<60x1xf32>
    %55 = vector.broadcast %54 : vector<60x1xf32> to vector<60x128xf32>
    %56 = arith.subf %1, %55 : vector<60x128xf32>
    %57 = arith.mulf %56, %56 : vector<60x128xf32>
    %58 = vector.extract_strided_slice %3 {offsets = [0, 5], sizes = [60, 1], strides = [1, 1]} : vector<60x16xf32> to vector<60x1xf32>
    %59 = vector.broadcast %58 : vector<60x1xf32> to vector<60x128xf32>
    %60 = arith.mulf %57, %59 : vector<60x128xf32>
    %61 = math.exp %60 : vector<60x128xf32>
    %cst_9 = arith.constant dense<0.000000e+00> : vector<128xf32>
    %62 = vector.multi_reduction <add>, %61, %cst_9 [0] : vector<60x128xf32> to vector<128xf32>
    %63 = vector.shape_cast %62 : vector<128xf32> to vector<1x128xf32>
    %64 = vector.extract_strided_slice %2 {offsets = [0, 6], sizes = [60, 1], strides = [1, 1]} : vector<60x16xf32> to vector<60x1xf32>
    %65 = vector.broadcast %64 : vector<60x1xf32> to vector<60x128xf32>
    %66 = arith.subf %1, %65 : vector<60x128xf32>
    %67 = arith.mulf %66, %66 : vector<60x128xf32>
    %68 = vector.extract_strided_slice %3 {offsets = [0, 6], sizes = [60, 1], strides = [1, 1]} : vector<60x16xf32> to vector<60x1xf32>
    %69 = vector.broadcast %68 : vector<60x1xf32> to vector<60x128xf32>
    %70 = arith.mulf %67, %69 : vector<60x128xf32>
    %71 = math.exp %70 : vector<60x128xf32>
    %cst_10 = arith.constant dense<0.000000e+00> : vector<128xf32>
    %72 = vector.multi_reduction <add>, %71, %cst_10 [0] : vector<60x128xf32> to vector<128xf32>
    %73 = vector.shape_cast %72 : vector<128xf32> to vector<1x128xf32>
    %74 = vector.extract_strided_slice %2 {offsets = [0, 7], sizes = [60, 1], strides = [1, 1]} : vector<60x16xf32> to vector<60x1xf32>
    %75 = vector.broadcast %74 : vector<60x1xf32> to vector<60x128xf32>
    %76 = arith.subf %1, %75 : vector<60x128xf32>
    %77 = arith.mulf %76, %76 : vector<60x128xf32>
    %78 = vector.extract_strided_slice %3 {offsets = [0, 7], sizes = [60, 1], strides = [1, 1]} : vector<60x16xf32> to vector<60x1xf32>
    %79 = vector.broadcast %78 : vector<60x1xf32> to vector<60x128xf32>
    %80 = arith.mulf %77, %79 : vector<60x128xf32>
    %81 = math.exp %80 : vector<60x128xf32>
    %cst_11 = arith.constant dense<0.000000e+00> : vector<128xf32>
    %82 = vector.multi_reduction <add>, %81, %cst_11 [0] : vector<60x128xf32> to vector<128xf32>
    %83 = vector.shape_cast %82 : vector<128xf32> to vector<1x128xf32>
    %84 = vector.extract_strided_slice %2 {offsets = [0, 8], sizes = [60, 1], strides = [1, 1]} : vector<60x16xf32> to vector<60x1xf32>
    %85 = vector.broadcast %84 : vector<60x1xf32> to vector<60x128xf32>
    %86 = arith.subf %1, %85 : vector<60x128xf32>
    %87 = arith.mulf %86, %86 : vector<60x128xf32>
    %88 = vector.extract_strided_slice %3 {offsets = [0, 8], sizes = [60, 1], strides = [1, 1]} : vector<60x16xf32> to vector<60x1xf32>
    %89 = vector.broadcast %88 : vector<60x1xf32> to vector<60x128xf32>
    %90 = arith.mulf %87, %89 : vector<60x128xf32>
    %91 = math.exp %90 : vector<60x128xf32>
    %cst_12 = arith.constant dense<0.000000e+00> : vector<128xf32>
    %92 = vector.multi_reduction <add>, %91, %cst_12 [0] : vector<60x128xf32> to vector<128xf32>
    %93 = vector.shape_cast %92 : vector<128xf32> to vector<1x128xf32>
    %94 = vector.extract_strided_slice %2 {offsets = [0, 9], sizes = [60, 1], strides = [1, 1]} : vector<60x16xf32> to vector<60x1xf32>
    %95 = vector.broadcast %94 : vector<60x1xf32> to vector<60x128xf32>
    %96 = arith.subf %1, %95 : vector<60x128xf32>
    %97 = arith.mulf %96, %96 : vector<60x128xf32>
    %98 = vector.extract_strided_slice %3 {offsets = [0, 9], sizes = [60, 1], strides = [1, 1]} : vector<60x16xf32> to vector<60x1xf32>
    %99 = vector.broadcast %98 : vector<60x1xf32> to vector<60x128xf32>
    %100 = arith.mulf %97, %99 : vector<60x128xf32>
    %101 = math.exp %100 : vector<60x128xf32>
    %cst_13 = arith.constant dense<0.000000e+00> : vector<128xf32>
    %102 = vector.multi_reduction <add>, %101, %cst_13 [0] : vector<60x128xf32> to vector<128xf32>
    %103 = vector.shape_cast %102 : vector<128xf32> to vector<1x128xf32>
    %104 = vector.extract_strided_slice %2 {offsets = [0, 10], sizes = [60, 1], strides = [1, 1]} : vector<60x16xf32> to vector<60x1xf32>
    %105 = vector.broadcast %104 : vector<60x1xf32> to vector<60x128xf32>
    %106 = arith.subf %1, %105 : vector<60x128xf32>
    %107 = arith.mulf %106, %106 : vector<60x128xf32>
    %108 = vector.extract_strided_slice %3 {offsets = [0, 10], sizes = [60, 1], strides = [1, 1]} : vector<60x16xf32> to vector<60x1xf32>
    %109 = vector.broadcast %108 : vector<60x1xf32> to vector<60x128xf32>
    %110 = arith.mulf %107, %109 : vector<60x128xf32>
    %111 = math.exp %110 : vector<60x128xf32>
    %cst_14 = arith.constant dense<0.000000e+00> : vector<128xf32>
    %112 = vector.multi_reduction <add>, %111, %cst_14 [0] : vector<60x128xf32> to vector<128xf32>
    %113 = vector.shape_cast %112 : vector<128xf32> to vector<1x128xf32>
    %114 = vector.extract_strided_slice %2 {offsets = [0, 11], sizes = [60, 1], strides = [1, 1]} : vector<60x16xf32> to vector<60x1xf32>
    %115 = vector.broadcast %114 : vector<60x1xf32> to vector<60x128xf32>
    %116 = arith.subf %1, %115 : vector<60x128xf32>
    %117 = arith.mulf %116, %116 : vector<60x128xf32>
    %118 = vector.extract_strided_slice %3 {offsets = [0, 11], sizes = [60, 1], strides = [1, 1]} : vector<60x16xf32> to vector<60x1xf32>
    %119 = vector.broadcast %118 : vector<60x1xf32> to vector<60x128xf32>
    %120 = arith.mulf %117, %119 : vector<60x128xf32>
    %121 = math.exp %120 : vector<60x128xf32>
    %cst_15 = arith.constant dense<0.000000e+00> : vector<128xf32>
    %122 = vector.multi_reduction <add>, %121, %cst_15 [0] : vector<60x128xf32> to vector<128xf32>
    %123 = vector.shape_cast %122 : vector<128xf32> to vector<1x128xf32>
    %124 = vector.extract_strided_slice %2 {offsets = [0, 12], sizes = [60, 1], strides = [1, 1]} : vector<60x16xf32> to vector<60x1xf32>
    %125 = vector.broadcast %124 : vector<60x1xf32> to vector<60x128xf32>
    %126 = arith.subf %1, %125 : vector<60x128xf32>
    %127 = arith.mulf %126, %126 : vector<60x128xf32>
    %128 = vector.extract_strided_slice %3 {offsets = [0, 12], sizes = [60, 1], strides = [1, 1]} : vector<60x16xf32> to vector<60x1xf32>
    %129 = vector.broadcast %128 : vector<60x1xf32> to vector<60x128xf32>
    %130 = arith.mulf %127, %129 : vector<60x128xf32>
    %131 = math.exp %130 : vector<60x128xf32>
    %cst_16 = arith.constant dense<0.000000e+00> : vector<128xf32>
    %132 = vector.multi_reduction <add>, %131, %cst_16 [0] : vector<60x128xf32> to vector<128xf32>
    %133 = vector.shape_cast %132 : vector<128xf32> to vector<1x128xf32>
    %134 = vector.extract_strided_slice %2 {offsets = [0, 13], sizes = [60, 1], strides = [1, 1]} : vector<60x16xf32> to vector<60x1xf32>
    %135 = vector.broadcast %134 : vector<60x1xf32> to vector<60x128xf32>
    %136 = arith.subf %1, %135 : vector<60x128xf32>
    %137 = arith.mulf %136, %136 : vector<60x128xf32>
    %138 = vector.extract_strided_slice %3 {offsets = [0, 13], sizes = [60, 1], strides = [1, 1]} : vector<60x16xf32> to vector<60x1xf32>
    %139 = vector.broadcast %138 : vector<60x1xf32> to vector<60x128xf32>
    %140 = arith.mulf %137, %139 : vector<60x128xf32>
    %141 = math.exp %140 : vector<60x128xf32>
    %cst_17 = arith.constant dense<0.000000e+00> : vector<128xf32>
    %142 = vector.multi_reduction <add>, %141, %cst_17 [0] : vector<60x128xf32> to vector<128xf32>
    %143 = vector.shape_cast %142 : vector<128xf32> to vector<1x128xf32>
    %144 = vector.extract_strided_slice %2 {offsets = [0, 14], sizes = [60, 1], strides = [1, 1]} : vector<60x16xf32> to vector<60x1xf32>
    %145 = vector.broadcast %144 : vector<60x1xf32> to vector<60x128xf32>
    %146 = arith.subf %1, %145 : vector<60x128xf32>
    %147 = arith.mulf %146, %146 : vector<60x128xf32>
    %148 = vector.extract_strided_slice %3 {offsets = [0, 14], sizes = [60, 1], strides = [1, 1]} : vector<60x16xf32> to vector<60x1xf32>
    %149 = vector.broadcast %148 : vector<60x1xf32> to vector<60x128xf32>
    %150 = arith.mulf %147, %149 : vector<60x128xf32>
    %151 = math.exp %150 : vector<60x128xf32>
    %cst_18 = arith.constant dense<0.000000e+00> : vector<128xf32>
    %152 = vector.multi_reduction <add>, %151, %cst_18 [0] : vector<60x128xf32> to vector<128xf32>
    %153 = vector.shape_cast %152 : vector<128xf32> to vector<1x128xf32>
    %154 = vector.extract_strided_slice %2 {offsets = [0, 15], sizes = [60, 1], strides = [1, 1]} : vector<60x16xf32> to vector<60x1xf32>
    %155 = vector.broadcast %154 : vector<60x1xf32> to vector<60x128xf32>
    %156 = arith.subf %1, %155 : vector<60x128xf32>
    %157 = arith.mulf %156, %156 : vector<60x128xf32>
    %158 = vector.extract_strided_slice %3 {offsets = [0, 15], sizes = [60, 1], strides = [1, 1]} : vector<60x16xf32> to vector<60x1xf32>
    %159 = vector.broadcast %158 : vector<60x1xf32> to vector<60x128xf32>
    %160 = arith.mulf %157, %159 : vector<60x128xf32>
    %161 = math.exp %160 : vector<60x128xf32>
    %cst_19 = arith.constant dense<0.000000e+00> : vector<128xf32>
    %162 = vector.multi_reduction <add>, %161, %cst_19 [0] : vector<60x128xf32> to vector<128xf32>
    %163 = vector.shape_cast %162 : vector<128xf32> to vector<1x128xf32>
    %164 = tpu.concatenate %13, %23, %33, %43, %53, %63, %73, %83, %93, %103, %113, %123, %133, %143, %153, %163 in 0 : vector<1x128xf32>, vector<1x128xf32>, vector<1x128xf32>, vector<1x128xf32>, vector<1x128xf32>, vector<1x128xf32>, vector<1x128xf32>, vector<1x128xf32>, vector<1x128xf32>, vector<1x128xf32>, vector<1x128xf32>, vector<1x128xf32>, vector<1x128xf32>, vector<1x128xf32>, vector<1x128xf32>, vector<1x128xf32> -> vector<16x128xf32>
    %cst_20 = arith.constant 0.0166666675 : f32
    %165 = vector.broadcast %cst_20 : f32 to vector<16x128xf32>
    %166 = arith.mulf %164, %165 : vector<16x128xf32>
    %c0_21 = arith.constant 0 : index
    %c0_22 = arith.constant 0 : index
    %167 = vector.load %arg4[%c0_21, %c0_22] : memref<16x128xf32, #tpu.memory_space<vmem>>, vector<16x128xf32>
    tpu.vector_store %arg4[%c0_21, %c0_22], %166 {strides = array<i32>} : memref<16x128xf32, #tpu.memory_space<vmem>>, vector<16x128xf32>,
    return
  }
  func.func @transform_0(%arg0: i32) -> (i32, i32) {
    %c0_i32 = arith.constant 0 : i32
    %c0_i32_0 = arith.constant 0 : i32
    return %arg0, %c0_i32 : i32, i32
  }
  func.func @transform_1(%arg0: i32) -> (i32, i32) {
    %c0_i32 = arith.constant 0 : i32
    %c0_i32_0 = arith.constant 0 : i32
    %c0_i32_1 = arith.constant 0 : i32
    return %c0_i32, %c0_i32_0 : i32, i32
  }
  func.func @transform_2(%arg0: i32) -> (i32, i32) {
    %c0_i32 = arith.constant 0 : i32
    %c0_i32_0 = arith.constant 0 : i32
    %c0_i32_1 = arith.constant 0 : i32
    return %c0_i32, %c0_i32_0 : i32, i32
  }
  func.func @transform_3(%arg0: i32) -> (i32, i32) {
    %c0_i32 = arith.constant 0 : i32
    %c0_i32_0 = arith.constant 0 : i32
    return %c0_i32, %arg0 : i32, i32
  }
}

</mosaic_0001>

<bundles_post_ra>
// kernel: tpu_custom_call.1
= control target key start
LH: loop header
LB: loop body
LE: loop exit
PB: predicated region body
PF: predicated region fallthrough
CT: control target
= control target key end

     0   :  { %v2391_v2 = vmov 0   ;;  %s3674_s0 = inlined_call_operand.vmem [shape: f32[128,60], index: 0, kind: input, shape index: {}]   ;;  %s3675_s1 = inlined_call_operand.vmem [shape: f32[60,16], index: 1, kind: input, shape index: {}]   ;;  %s3676_s2 = inlined_call_operand.vmem [shape: f32[60,16], index: 2, kind: input, shape index: {}]   ;;  %s3677_s3 = inlined_call_operand.hbm [shape: f32[16,128], index: 3, kind: output, shape index: {}]  }
   0x1   :  { %v15_v0 = vld [vmem:[%s3674_s0] sm:$0xff]  ;;  %2043 = vset.pattern.permute.xlu1 %v2391_v2  ;;  %v16_v3 = vld [vmem:[%s3674_s0 + $0x8] sm:$0xff]  ;;  %v17_v5 = vld [vmem:[%s3674_s0 + $0x10] sm:$0xff] }
   0x2   :  { %v2436_v1 = vld [vmem:[%s3675_s1] sm:$0xff]  ;;  %31 = vxpose.xlu0.b32.start [1/16] (narrow) %v15_v0, 64  ;;  %v2445_v4 = vld [vmem:[%s3675_s1 + $0x8] sm:$0xff]  ;;  %v2454_v6 = vld [vmem:[%s3675_s1 + $0x10] sm:$0xff] }
   0x3   :  { %81 = vperm.xlu1 %2043, %v2436_v1   ;;  %v18_v7 = vld [vmem:[%s3674_s0 + $0x18] sm:$0xff] }
   0x6   :  { %32 = vxpose.xlu0.b32.cont [2/16] (narrow) %v16_v3, 64 }
   0x7   :  { %86 = vperm.xlu1 %2043, %v2445_v4  }
   0xa   :  { %33 = vxpose.xlu0.b32.cont [3/16] (narrow) %v17_v5, 64 }
   0xb   :  { %91 = vperm.xlu1 %2043, %v2454_v6  }
   0xc   :  { %8 = vsyncpa [#allocation3], 0  ;;  %v2463_v8 = vld [vmem:[%s3675_s1 + $0x18] sm:$0xff]  ;;  %v19_v9 = vld [vmem:[%s3674_s0 + $0x20] sm:$0xff]  ;;  %v2392_v33 = vmov 1   ;;  %v2393_v34 = vmov 2  }
   0xd   :  { %v2472_v10 = vld [vmem:[%s3675_s1 + $0x20] sm:$0xff]  ;;  %v20_v11 = vld [vmem:[%s3674_s0 + $0x28] sm:$0xff]  ;;  %v21_v13 = vld [vmem:[%s3674_s0 + $0x30] sm:$0xff]  ;;  %v2394_v40 = vmov 3   ;;  %v2395_v49 = vmov 4   ;;  %v2396_v63 = vmov 5  }
   0xe   :  { %34 = vxpose.xlu0.b32.cont [4/16] (narrow) %v18_v7, 64  ;;  %v2481_v12 = vld [vmem:[%s3675_s1 + $0x28] sm:$0xff]  ;;  %v2490_v14 = vld [vmem:[%s3675_s1 + $0x30] sm:$0xff]  ;;  %v22_v15 = vld [vmem:[%s3674_s0 + $0x38] sm:$0xff]  ;;  %vm205_vm0 = vcmask 1043456   ;;  %vm1984_vm1 = vcmask 1040384  }
   0xf   :  { %96 = vperm.xlu1 %2043, %v2463_v8   ;;  %v2499_v16 = vld [vmem:[%s3675_s1 + $0x38] sm:$0xf]  ;;  %v23_v17 = vld [vmem:[%s3674_s0 + $0x40] sm:$0xff]  ;;  %v24_v19 = vld [vmem:[%s3674_s0 + $0x48] sm:$0xff]  ;;  %vm1986_vm2 = vcmask 1041408   ;;  %vm1988_vm3 = vcmask 1042432  }
  0x10   :  { %v2508_v18 = vld [vmem:[%s3676_s2] sm:$0xff]  ;;  %v2517_v20 = vld [vmem:[%s3676_s2 + $0x8] sm:$0xff]  ;;  %v25_v21 = vld [vmem:[%s3674_s0 + $0x50] sm:$0xff]  ;;  %vm1991_vm4 = vcmask 1044480   ;;  %vm1993_vm5 = vcmask 1045504   ;;  %vm1995_vm6 = vcmask 1046528  }
  0x11   :  { %v2526_v22 = vld [vmem:[%s3676_s2 + $0x10] sm:$0xff]  ;;  %v26_v23 = vld [vmem:[%s3674_s0 + $0x58] sm:$0xff]  ;;  %v27_v25 = vld [vmem:[%s3674_s0 + $0x60] sm:$0xff] }
  0x12   :  { %35 = vxpose.xlu0.b32.cont [5/16] (narrow) %v19_v9, 64  ;;  %v2535_v24 = vld [vmem:[%s3676_s2 + $0x18] sm:$0xff]  ;;  %v2544_v26 = vld [vmem:[%s3676_s2 + $0x20] sm:$0xff]  ;;  %v28_v27 = vld [vmem:[%s3674_s0 + $0x68] sm:$0xff] }
  0x13   :  { %101 = vperm.xlu1 %2043, %v2472_v10   ;;  %v2553_v28 = vld [vmem:[%s3676_s2 + $0x28] sm:$0xff]  ;;  %v29_v29 = vld [vmem:[%s3674_s0 + $0x70] sm:$0xff]  ;;  %v30_v31 = vld [vmem:[%s3674_s0 + $0x78] sm:$0xff] }
  0x14   :  { %v2562_v30 = vld [vmem:[%s3676_s2 + $0x30] sm:$0xff]  ;;  %v2571_v32 = vld [vmem:[%s3676_s2 + $0x38] sm:$0xf] }
  0x16   :  { %36 = vxpose.xlu0.b32.cont [6/16] (narrow) %v20_v11, 64 }
  0x17   :  { %106 = vperm.xlu1 %2043, %v2481_v12  }
  0x1a   :  { %37 = vxpose.xlu0.b32.cont [7/16] (narrow) %v21_v13, 64 }
  0x1b   :  { %111 = vperm.xlu1 %2043, %v2490_v14  }
  0x1e   :  { %38 = vxpose.xlu0.b32.cont [8/16] (narrow) %v22_v15, 64 }
  0x1f   :  { %116 = vperm.xlu1 %2043, %v2499_v16  }
  0x22   :  { %39 = vxpose.xlu0.b32.cont [9/16] (narrow) %v23_v17, 64 }
  0x23   :  { %137 = vperm.xlu1 %2043, %v2508_v18  }
  0x26   :  { %40 = vxpose.xlu0.b32.cont [10/16] (narrow) %v24_v19, 64 }
  0x27   :  { %142 = vperm.xlu1 %2043, %v2517_v20  }
  0x2a   :  { %41 = vxpose.xlu0.b32.cont [11/16] (narrow) %v25_v21, 64 }
  0x2b   :  { %147 = vperm.xlu1 %2043, %v2526_v22  }
  0x2e   :  { %42 = vxpose.xlu0.b32.cont [12/16] (narrow) %v26_v23, 64 }
  0x2f   :  { %152 = vperm.xlu1 %2043, %v2535_v24  }
  0x32   :  { %43 = vxpose.xlu0.b32.cont [13/16] (narrow) %v27_v25, 64  ;;  %v2397_v25 = vmov 6  }
  0x33   :  { %157 = vperm.xlu1 %2043, %v2544_v26  }
  0x36   :  { %44 = vxpose.xlu0.b32.cont [14/16] (narrow) %v28_v27, 64 }
  0x37   :  { %162 = vperm.xlu1 %2043, %v2553_v28  }
  0x3a   :  { %45 = vxpose.xlu0.b32.cont [15/16] (narrow) %v29_v29, 64 }
  0x3b   :  { %167 = vperm.xlu1 %2043, %v2562_v30  }
  0x3e   :  { %46 = vxpose.xlu0.b32.end [16/16] (narrow) %v30_v31, 64 }
  0x3f   :  { %172 = vperm.xlu1 %2043, %v2571_v32  }
  0x43   :  { %2045 = vset.pattern.permute.xlu1 %v2392_v33 }
  0x44   :  { %219 = vperm.xlu1 %2045, %v2445_v4  }
  0x48   :  { %223 = vperm.xlu1 %2045, %v2454_v6  }
  0x4c   :  { %227 = vperm.xlu1 %2045, %v2463_v8  }
  0x50   :  { %231 = vperm.xlu1 %2045, %v2472_v10  }
  0x54   :  { %235 = vperm.xlu1 %2045, %v2481_v12  }
  0x58   :  { %239 = vperm.xlu1 %2045, %v2490_v14  }
  0x5c   :  { %243 = vperm.xlu1 %2045, %v2499_v16  }
  0x60   :  { %263 = vperm.xlu1 %2045, %v2508_v18  }
  0x64   :  { %267 = vperm.xlu1 %2045, %v2517_v20  }
  0x67   :  { %2044 = vset.pattern.permute.xlu0 %v2392_v33 }
  0x68   :  { %271 = vperm.xlu1 %2045, %v2526_v22   ;;  %215 = vperm.xlu0 %2044, %v2436_v1  }
  0x6c   :  { %275 = vperm.xlu1 %2045, %v2535_v24   ;;  %279 = vperm.xlu0 %2044, %v2544_v26  }
  0x70   :  { %283 = vperm.xlu1 %2045, %v2553_v28   ;;  %287 = vperm.xlu0 %2044, %v2562_v30  }
  0x74   :  { %291 = vperm.xlu1 %2045, %v2571_v32   ;;  %2046 = vset.pattern.permute.xlu0 %v2393_v34 }
  0x75   :  { %333 = vperm.xlu0 %2046, %v2436_v1  }
  0x78   :  { %2047 = vset.pattern.permute.xlu1 %v2393_v34 }
  0x79   :  { %337 = vperm.xlu1 %2047, %v2445_v4   ;;  %345 = vperm.xlu0 %2046, %v2463_v8  }
  0x7d   :  { %341 = vperm.xlu1 %2047, %v2454_v6   ;;  %353 = vperm.xlu0 %2046, %v2481_v12  }
  0x81   :  { %349 = vperm.xlu1 %2047, %v2472_v10   ;;  %361 = vperm.xlu0 %2046, %v2499_v16  }
  0x82   :  { %v2597_v35 = vpop.permute.xlu1 %81  ;;  %v2651_v51 = vpop.trf.xlu0 }
  0x85   :  { %357 = vperm.xlu1 %2047, %v2490_v14   ;;  %385 = vperm.xlu0 %2046, %v2517_v20  }
  0x86   :  { %v2601_v36 = vpop.permute.xlu1 %86  ;;  %v2659_v54 = vpop.trf.xlu0 }
  0x89   :  { %381 = vperm.xlu1 %2047, %v2508_v18   ;;  %393 = vperm.xlu0 %2046, %v2535_v24  }
  0x8a   :  { %v2605_v37 = vpop.permute.xlu1 %91  ;;  %v2667_v56 = vpop.trf.xlu0 }
  0x8d   :  { %389 = vperm.xlu1 %2047, %v2526_v22   ;;  %401 = vperm.xlu0 %2046, %v2553_v28  }
  0x8e   :  { %v2609_v38 = vpop.permute.xlu1 %96  ;;  %v2673_v58 = vpop.trf.xlu0 }
  0x91   :  { %397 = vperm.xlu1 %2047, %v2544_v26   ;;  %409 = vperm.xlu0 %2046, %v2571_v32  }
  0x92   :  { %v2613_v39 = vpop.permute.xlu1 %101  ;;  %v2683_v61 = vpop.trf.xlu0 }
  0x95   :  { %405 = vperm.xlu1 %2047, %v2562_v30   ;;  %2049 = vset.pattern.permute.xlu0 %v2394_v40 }
  0x96   :  { %v2616_v41 = vpop.permute.xlu1 %106  ;;  %455 = vperm.xlu0 %2049, %v2445_v4   ;;  %v2689_v0 = vpop.trf.xlu0 }
  0x99   :  { %2048 = vset.pattern.permute.xlu1 %v2394_v40 }
  0x9a   :  { %451 = vperm.xlu1 %2048, %v2436_v1   ;;  %v2620_v42 = vpop.permute.xlu1 %111  ;;  %467 = vperm.xlu0 %2049, %v2472_v10   ;;  %v2699_v5 = vpop.trf.xlu0 }
  0x9e   :  { %459 = vperm.xlu1 %2048, %v2454_v6   ;;  %v2624_v43 = vpop.permute.xlu1 %116  ;;  %475 = vperm.xlu0 %2049, %v2490_v14   ;;  %v2705_v9 = vpop.trf.xlu0 }
  0xa2   :  { %463 = vperm.xlu1 %2048, %v2463_v8   ;;  %v2628_v44 = vpop.permute.xlu1 %137  ;;  %499 = vperm.xlu0 %2049, %v2508_v18  }
  0xa6   :  { %471 = vperm.xlu1 %2048, %v2481_v12   ;;  %v2632_v45 = vpop.permute.xlu1 %142  ;;  %507 = vperm.xlu0 %2049, %v2526_v22  }
  0xaa   :  { %479 = vperm.xlu1 %2048, %v2499_v16   ;;  %v2636_v46 = vpop.permute.xlu1 %147  ;;  %515 = vperm.xlu0 %2049, %v2544_v26  }
  0xae   :  { %503 = vperm.xlu1 %2048, %v2517_v20   ;;  %v2640_v47 = vpop.permute.xlu1 %152  ;;  %523 = vperm.xlu0 %2049, %v2562_v30  }
  0xb2   :  { %511 = vperm.xlu1 %2048, %v2535_v24   ;;  %v2644_v48 = vpop.permute.xlu1 %157  ;;  %2050 = vset.pattern.permute.xlu0 %v2395_v49 }
  0xb3   :  { %569 = vperm.xlu0 %2050, %v2436_v1  }
  0xb6   :  { %519 = vperm.xlu1 %2048, %v2553_v28   ;;  %v2648_v50 = vpop.permute.xlu1 %162 }
  0xb7   :  { %581 = vperm.xlu0 %2050, %v2463_v8  }
  0xba   :  { %527 = vperm.xlu1 %2048, %v2571_v32   ;;  %v2654_v52 = vpop.permute.xlu1 %167 }
  0xbb   :  { %589 = vperm.xlu0 %2050, %v2481_v12  }
  0xbe   :  { %2051 = vset.pattern.permute.xlu1 %v2395_v49  ;;  %v2657_v53 = vpop.permute.xlu1 %172 }
  0xbf   :  { %573 = vperm.xlu1 %2051, %v2445_v4   ;;  %597 = vperm.xlu0 %2050, %v2499_v16  }
  0xc3   :  { %577 = vperm.xlu1 %2051, %v2454_v6   ;;  %v2664_v55 = vpop.permute.xlu1 %219  ;;  %621 = vperm.xlu0 %2050, %v2517_v20  }
  0xc7   :  { %585 = vperm.xlu1 %2051, %v2472_v10   ;;  %v2670_v57 = vpop.permute.xlu1 %223  ;;  %629 = vperm.xlu0 %2050, %v2535_v24  }
  0xcb   :  { %593 = vperm.xlu1 %2051, %v2490_v14   ;;  %v2676_v59 = vpop.permute.xlu1 %227  ;;  %637 = vperm.xlu0 %2050, %v2553_v28  }
  0xcf   :  { %617 = vperm.xlu1 %2051, %v2508_v18   ;;  %v2680_v60 = vpop.permute.xlu1 %231  ;;  %645 = vperm.xlu0 %2050, %v2571_v32  }
  0xd3   :  { %625 = vperm.xlu1 %2051, %v2526_v22   ;;  %v2686_v62 = vpop.permute.xlu1 %235  ;;  %2053 = vset.pattern.permute.xlu0 %v2396_v63 }
  0xd4   :  { %691 = vperm.xlu0 %2053, %v2445_v4  }
  0xd7   :  { %633 = vperm.xlu1 %2051, %v2544_v26   ;;  %v2692_v2 = vpop.permute.xlu1 %239 }
  0xd8   :  { %703 = vperm.xlu0 %2053, %v2472_v10  }
  0xdb   :  { %641 = vperm.xlu1 %2051, %v2562_v30   ;;  %v2696_v3 = vpop.permute.xlu1 %243 }
  0xdc   :  { %711 = vperm.xlu0 %2053, %v2490_v14  }
  0xdf   :  { %2052 = vset.pattern.permute.xlu1 %v2396_v63  ;;  %v2701_v7 = vpop.permute.xlu1 %263 }
  0xe0   :  { %687 = vperm.xlu1 %2052, %v2436_v1   ;;  %735 = vperm.xlu0 %2053, %v2508_v18  }
  0xe3   :  { %v2707_v11 = vpop.permute.xlu1 %267 }
  0xe4   :  { %695 = vperm.xlu1 %2052, %v2454_v6   ;;  %743 = vperm.xlu0 %2053, %v2526_v22  }
  0xe7   :  { %v2711_v13 = vpop.permute.xlu1 %271  ;;  %v2713_v15 = vpop.permute.xlu0 %215 }
  0xe8   :  { %699 = vperm.xlu1 %2052, %v2463_v8   ;;  %751 = vperm.xlu0 %2053, %v2544_v26  }
  0xeb   :  { %v2717_v17 = vpop.permute.xlu1 %275  ;;  %v2719_v19 = vpop.permute.xlu0 %279 }
  0xec   :  { %707 = vperm.xlu1 %2052, %v2481_v12   ;;  %759 = vperm.xlu0 %2053, %v2562_v30  }
  0xef   :  { %v2723_v21 = vpop.permute.xlu1 %283  ;;  %v2725_v23 = vpop.permute.xlu0 %287 }
  0xf0   :  { %3688 = vst [vmem:[#allocation5_spill] sm:$0xff] %v2723_v21  ;;  %3689 = vst [vmem:[#allocation6_spill] sm:$0xff] %v2725_v23  ;;  %715 = vperm.xlu1 %2052, %v2499_v16   ;;  %2054 = vset.pattern.permute.xlu0 %v2397_v25 }
  0xf1   :  { %805 = vperm.xlu0 %2054, %v2436_v1  }
  0xf3   :  { %v2729_v27 = vpop.permute.xlu1 %291 }
  0xf4   :  { %3690 = vst [vmem:[#allocation7_spill] sm:$0xff] %v2729_v27  ;;  %739 = vperm.xlu1 %2052, %v2517_v20   ;;  %v2732_v29 = vpop.permute.xlu0 %333 }
  0xf5   :  { %817 = vperm.xlu0 %2054, %v2463_v8  }
  0xf8   :  { %747 = vperm.xlu1 %2052, %v2535_v24   ;;  %v2736_v31 = vpop.permute.xlu1 %337  ;;  %v2738_v33 = vpop.permute.xlu0 %345 }
  0xf9   :  { %825 = vperm.xlu0 %2054, %v2481_v12  }
  0xfc   :  { %755 = vperm.xlu1 %2052, %v2553_v28   ;;  %v2742_v34 = vpop.permute.xlu1 %341  ;;  %v2744_v40 = vpop.permute.xlu0 %353 }
  0xfd   :  { %3691 = vst [vmem:[#allocation8_spill] sm:$0xff] %v2744_v40  ;;  %833 = vperm.xlu0 %2054, %v2499_v16  }
 0x100   :  { %763 = vperm.xlu1 %2052, %v2571_v32   ;;  %v2748_v49 = vpop.permute.xlu1 %349  ;;  %v2750_v63 = vpop.permute.xlu0 %361 }
 0x101   :  { %3692 = vst [vmem:[#allocation9_spill] sm:$0xff] %v2748_v49  ;;  %3693 = vst [vmem:[#allocation10_spill] sm:$0xff] %v2750_v63  ;;  %857 = vperm.xlu0 %2054, %v2517_v20  }
 0x104   :  { %2055 = vset.pattern.permute.xlu1 %v2397_v25  ;;  %v2753_v27 = vpop.permute.xlu1 %357  ;;  %v2755_v23 = vpop.permute.xlu0 %385 }
 0x105   :  { %3694 = vst [vmem:[#allocation11_spill] sm:$0xff] %v2753_v27  ;;  %3695 = vst [vmem:[#allocation12_spill] sm:$0xff] %v2755_v23  ;;  %809 = vperm.xlu1 %2055, %v2445_v4   ;;  %865 = vperm.xlu0 %2054, %v2535_v24   ;;  %v2398_v23 = vmov 7  }
 0x108   :  { %v2759_v21 = vpop.permute.xlu1 %381  ;;  %v2761_v40 = vpop.permute.xlu0 %393 }
 0x109   :  { %3696 = vst [vmem:[#allocation13_spill] sm:$0xff] %v2759_v21  ;;  %3697 = vst [vmem:[#allocation14_spill] sm:$0xff] %v2761_v40  ;;  %813 = vperm.xlu1 %2055, %v2454_v6   ;;  %873 = vperm.xlu0 %2054, %v2553_v28  }
 0x10c   :  { %v2765_v49 = vpop.permute.xlu1 %389  ;;  %v2767_v63 = vpop.permute.xlu0 %401 }
 0x10d   :  { %3698 = vst [vmem:[#allocation15_spill] sm:$0xff] %v2765_v49  ;;  %3699 = vst [vmem:[#allocation16_spill] sm:$0xff] %v2767_v63  ;;  %821 = vperm.xlu1 %2055, %v2472_v10   ;;  %881 = vperm.xlu0 %2054, %v2571_v32  }
 0x110   :  { %v2771_v25 = vpop.permute.xlu1 %397  ;;  %v2773_v27 = vpop.permute.xlu0 %409 }
 0x111   :  { %3700 = vst [vmem:[#allocation17_spill] sm:$0xff] %v2771_v25  ;;  %3701 = vst [vmem:[#allocation18_spill] sm:$0xff] %v2773_v27  ;;  %829 = vperm.xlu1 %2055, %v2490_v14   ;;  %2057 = vset.pattern.permute.xlu0 %v2398_v23 }
 0x112   :  { %927 = vperm.xlu0 %2057, %v2445_v4  }
 0x114   :  { %v2777_v40 = vpop.permute.xlu1 %405 }
 0x115   :  { %3702 = vst [vmem:[#allocation19_spill] sm:$0xff] %v2777_v40  ;;  %853 = vperm.xlu1 %2055, %v2508_v18   ;;  %v2780_v49 = vpop.permute.xlu0 %455 }
 0x116   :  { %3703 = vst [vmem:[#allocation20_spill] sm:$0xff] %v2780_v49  ;;  %939 = vperm.xlu0 %2057, %v2472_v10  }
 0x119   :  { %861 = vperm.xlu1 %2055, %v2526_v22   ;;  %v2784_v63 = vpop.permute.xlu1 %451  ;;  %v2786_v25 = vpop.permute.xlu0 %467 }
 0x11a   :  { %3704 = vst [vmem:[#allocation21_spill] sm:$0xff] %v2784_v63  ;;  %3705 = vst [vmem:[#allocation22_spill] sm:$0xff] %v2786_v25  ;;  %947 = vperm.xlu0 %2057, %v2490_v14  }
 0x11d   :  { %869 = vperm.xlu1 %2055, %v2544_v26   ;;  %v2790_v27 = vpop.permute.xlu1 %459  ;;  %v2792_v21 = vpop.permute.xlu0 %475 }
 0x11e   :  { %3706 = vst [vmem:[#allocation23_spill] sm:$0xff] %v2790_v27  ;;  %3707 = vst [vmem:[#allocation24_spill] sm:$0xff] %v2792_v21  ;;  %971 = vperm.xlu0 %2057, %v2508_v18  }
 0x121   :  { %877 = vperm.xlu1 %2055, %v2562_v30   ;;  %v2796_v40 = vpop.permute.xlu1 %463  ;;  %v2798_v49 = vpop.permute.xlu0 %499 }
 0x122   :  { %3708 = vst [vmem:[#allocation25_spill] sm:$0xff] %v2796_v40  ;;  %3709 = vst [vmem:[#allocation26_spill] sm:$0xff] %v2798_v49  ;;  %979 = vperm.xlu0 %2057, %v2526_v22  }
 0x125   :  { %2056 = vset.pattern.permute.xlu1 %v2398_v23  ;;  %v2801_v25 = vpop.permute.xlu1 %471  ;;  %v2803_v63 = vpop.permute.xlu0 %507  ;;  %v2399_v23 = vmov 8  }
 0x126   :  { %3710 = vst [vmem:[#allocation27_spill] sm:$0xff] %v2801_v25  ;;  %3711 = vst [vmem:[#allocation28_spill] sm:$0xff] %v2803_v63  ;;  %923 = vperm.xlu1 %2056, %v2436_v1   ;;  %987 = vperm.xlu0 %2057, %v2544_v26  }
 0x129   :  { %v2807_v21 = vpop.permute.xlu1 %479  ;;  %v2809_v27 = vpop.permute.xlu0 %515 }
 0x12a   :  { %3712 = vst [vmem:[#allocation29_spill] sm:$0xff] %v2807_v21  ;;  %3713 = vst [vmem:[#allocation30_spill] sm:$0xff] %v2809_v27  ;;  %931 = vperm.xlu1 %2056, %v2454_v6   ;;  %995 = vperm.xlu0 %2057, %v2562_v30  }
 0x12d   :  { %v2813_v40 = vpop.permute.xlu1 %503  ;;  %v2815_v49 = vpop.permute.xlu0 %523 }
 0x12e   :  { %3714 = vst [vmem:[#allocation31_spill] sm:$0xff] %v2813_v40  ;;  %3715 = vst [vmem:[#allocation32_spill] sm:$0xff] %v2815_v49  ;;  %935 = vperm.xlu1 %2056, %v2463_v8   ;;  %2058 = vset.pattern.permute.xlu0 %v2399_v23 }
 0x12f   :  { %1041 = vperm.xlu0 %2058, %v2436_v1  }
 0x131   :  { %v2819_v63 = vpop.permute.xlu1 %511 }
 0x132   :  { %3716 = vst [vmem:[#allocation33_spill] sm:$0xff] %v2819_v63  ;;  %943 = vperm.xlu1 %2056, %v2481_v12   ;;  %v2822_v21 = vpop.permute.xlu0 %569 }
 0x133   :  { %3717 = vst [vmem:[#allocation34_spill] sm:$0xff] %v2822_v21  ;;  %1053 = vperm.xlu0 %2058, %v2463_v8  }
 0x135   :  { %v2825_v27 = vpop.permute.xlu1 %519 }
 0x136   :  { %3718 = vst [vmem:[#allocation35_spill] sm:$0xff] %v2825_v27  ;;  %951 = vperm.xlu1 %2056, %v2499_v16   ;;  %v2828_v25 = vpop.permute.xlu0 %581 }
 0x137   :  { %3719 = vst [vmem:[#allocation36_spill] sm:$0xff] %v2828_v25  ;;  %1061 = vperm.xlu0 %2058, %v2481_v12  }
 0x139   :  { %v2831_v49 = vpop.permute.xlu1 %527 }
 0x13a   :  { %3720 = vst [vmem:[#allocation37_spill] sm:$0xff] %v2831_v49  ;;  %975 = vperm.xlu1 %2056, %v2517_v20   ;;  %v2834_v40 = vpop.permute.xlu0 %589 }
 0x13b   :  { %3721 = vst [vmem:[#allocation38_spill] sm:$0xff] %v2834_v40  ;;  %1069 = vperm.xlu0 %2058, %v2499_v16  }
 0x13e   :  { %983 = vperm.xlu1 %2056, %v2535_v24   ;;  %v2838_v21 = vpop.permute.xlu1 %573  ;;  %v2840_v63 = vpop.permute.xlu0 %597 }
 0x13f   :  { %3722 = vst [vmem:[#allocation39_spill] sm:$0xff] %v2838_v21  ;;  %3723 = vst [vmem:[#allocation40_spill] sm:$0xff] %v2840_v63  ;;  %1093 = vperm.xlu0 %2058, %v2517_v20  }
 0x142   :  { %991 = vperm.xlu1 %2056, %v2553_v28   ;;  %v2844_v25 = vpop.permute.xlu1 %577  ;;  %v2846_v27 = vpop.permute.xlu0 %621 }
 0x143   :  { %3724 = vst [vmem:[#allocation41_spill] sm:$0xff] %v2844_v25  ;;  %3725 = vst [vmem:[#allocation42_spill] sm:$0xff] %v2846_v27  ;;  %1101 = vperm.xlu0 %2058, %v2535_v24  }
 0x146   :  { %999 = vperm.xlu1 %2056, %v2571_v32   ;;  %v2850_v40 = vpop.permute.xlu1 %585  ;;  %v2852_v49 = vpop.permute.xlu0 %629 }
 0x147   :  { %3726 = vst [vmem:[#allocation43_spill] sm:$0xff] %v2850_v40  ;;  %3727 = vst [vmem:[#allocation44_spill] sm:$0xff] %v2852_v49  ;;  %1109 = vperm.xlu0 %2058, %v2553_v28   ;;  %v2400_v40 = vmov 9  }
 0x14a   :  { %2059 = vset.pattern.permute.xlu1 %v2399_v23  ;;  %v2855_v63 = vpop.permute.xlu1 %593  ;;  %v2857_v21 = vpop.permute.xlu0 %637 }
 0x14b   :  { %3728 = vst [vmem:[#allocation45_spill] sm:$0xff] %v2855_v63  ;;  %3729 = vst [vmem:[#allocation46_spill] sm:$0xff] %v2857_v21  ;;  %1045 = vperm.xlu1 %2059, %v2445_v4   ;;  %1117 = vperm.xlu0 %2058, %v2571_v32  }
 0x14e   :  { %v2861_v27 = vpop.permute.xlu1 %617  ;;  %v2863_v25 = vpop.permute.xlu0 %645 }
 0x14f   :  { %3730 = vst [vmem:[#allocation47_spill] sm:$0xff] %v2861_v27  ;;  %3731 = vst [vmem:[#allocation48_spill] sm:$0xff] %v2863_v25  ;;  %1049 = vperm.xlu1 %2059, %v2454_v6   ;;  %2061 = vset.pattern.permute.xlu0 %v2400_v40  ;;  %v120_v25 = vsub.f32 %v2659_v54, %v2601_v36 }
 0x150   :  { %1163 = vperm.xlu0 %2061, %v2445_v4   ;;  %v119_v4 = vsub.f32 %v2651_v51, %v2597_v35 }
 0x152   :  { %v2867_v49 = vpop.permute.xlu1 %625 }
 0x153   :  { %3732 = vst [vmem:[#allocation49_spill] sm:$0xff] %v2867_v49  ;;  %1057 = vperm.xlu1 %2059, %v2472_v10   ;;  %v2870_v23 = vpop.permute.xlu0 %691 }
 0x154   :  { %3733 = vst [vmem:[#allocation50_spill] sm:$0xff] %v2870_v23  ;;  %1175 = vperm.xlu0 %2061, %v2472_v10   ;;  %v128_v10 = vmul.f32 %v120_v25, %v120_v25 }
 0x156   :  { %v2873_v63 = vpop.permute.xlu1 %633  ;;  %v176_v36 = vmul.f32 %v2632_v45, %v128_v10  ;;  %v246_v10 = vsub.f32 %v2651_v51, %v2713_v15  ;;  %v247_v15 = vsub.f32 %v2659_v54, %v2664_v55  ;;  %v3678_v55 = vmov 10  }
 0x157   :  { %3734 = vst [vmem:[#allocation51_spill] sm:$0xff] %v2873_v63  ;;  %1065 = vperm.xlu1 %2059, %v2490_v14   ;;  %v2876_v21 = vpop.permute.xlu0 %703  ;;  %v121_v63 = vsub.f32 %v2667_v56, %v2605_v37 }
 0x158   :  { %3735 = vst [vmem:[#allocation52_spill] sm:$0xff] %v2876_v21  ;;  %1183 = vperm.xlu0 %2061, %v2490_v14   ;;  %v127_v21 = vmul.f32 %v119_v4, %v119_v4  ;;  %v185_v25 = vmul.f32 1.442695, %v176_v36 }
 0x159   :  { %v129_v23 = vmul.f32 %v121_v63, %v121_v63  ;;  %v254_v63 = vmul.f32 %v246_v10, %v246_v10 }
 0x15a   :  { %v2883_v49 = vpop.permute.xlu1 %641  ;;  %2084 = vpow2.f32 %v185_v25  ;;  %v255_v25 = vmul.f32 %v247_v15, %v247_v15  ;;  %v250_v15 = vsub.f32 %v2683_v61, %v2680_v60  ;;  %v365_v60 = vsub.f32 %v2659_v54, %v2736_v31 }
 0x15b   :  { %3736 = vst [vmem:[#allocation53_spill] sm:$0xff] %v2883_v49  ;;  %1089 = vperm.xlu1 %2059, %v2508_v18   ;;  %v2886_v27 = vpop.permute.xlu0 %711  ;;  %v175_v49 = vmul.f32 %v2628_v44, %v127_v21  ;;  %v367_v31 = vsub.f32 %v2673_v58, %v2738_v33  ;;  %v253_v33 = vsub.f32 %v2705_v9, %v2696_v3 }
 0x15c   :  { %3737 = vst [vmem:[#allocation54_spill] sm:$0xff] %v2886_v27  ;;  %1207 = vperm.xlu0 %2061, %v2508_v18   ;;  %v177_v27 = vmul.f32 %v2636_v46, %v129_v23  ;;  %v122_v18 = vsub.f32 %v2673_v58, %v2609_v38 }
 0x15d   :  { %v183_v4 = vmul.f32 1.442695, %v175_v49 }
 0x15e   :  { %v187_v44 = vmul.f32 1.442695, %v177_v27  ;;  %v130_v46 = vmul.f32 %v122_v18, %v122_v18  ;;  %v294_v18 = vmul.f32 %v2701_v7, %v254_v63 }
 0x15f   :  { %1097 = vperm.xlu1 %2059, %v2526_v22   ;;  %v2893_v14 = vpop.permute.xlu1 %687  ;;  %v2895_v35 = vpop.permute.xlu0 %735  ;;  %2086 = vpow2.f32 %v183_v4 }
 0x160   :  { %1215 = vperm.xlu0 %2061, %v2526_v22   ;;  %v123_v22 = vsub.f32 %v2683_v61, %v2613_v39  ;;  %v178_v49 = vmul.f32 %v2640_v47, %v130_v46  ;;  %2088 = vpow2.f32 %v187_v44  ;;  %v248_v47 = vsub.f32 %v2667_v56, %v2670_v57 }
 0x161   :  { %v295_v57 = vmul.f32 %v2707_v11, %v255_v25  ;;  %v302_v44 = vmul.f32 1.442695, %v294_v18 }
 0x162   :  { %v189_v36 = vmul.f32 1.442695, %v178_v49 }
 0x163   :  { %1105 = vperm.xlu1 %2059, %v2544_v26   ;;  %v2903_v37 = vpop.permute.xlu1 %695  ;;  %v2905_v45 = vpop.permute.xlu0 %743  ;;  %v304_v63 = vmul.f32 1.442695, %v295_v57 }
 0x164   :  { %1223 = vperm.xlu0 %2061, %v2544_v26   ;;  %v131_v26 = vmul.f32 %v123_v22, %v123_v22  ;;  %v2085_v10 = vpop.eup %2084  ;;  %2090 = vpow2.f32 %v189_v36  ;;  %v256_v22 = vmul.f32 %v248_v47, %v248_v47  ;;  %v251_v47 = vsub.f32 %v2689_v0, %v2686_v62 }
 0x166   :  { %v179_v39 = vmul.f32 %v2644_v48, %v131_v26  ;;  %v125_v48 = vsub.f32 %v2699_v5, %v2620_v42 }
 0x167   :  { %1113 = vperm.xlu1 %2059, %v2562_v30   ;;  %v2913_v38 = vpop.permute.xlu1 %699  ;;  %v2915_v21 = vpop.permute.xlu0 %751 }
 0x168   :  { %1231 = vperm.xlu0 %2061, %v2562_v30   ;;  %v124_v30 = vsub.f32 %v2689_v0, %v2616_v41  ;;  %v191_v4 = vmul.f32 1.442695, %v179_v39  ;;  %v133_v42 = vmul.f32 %v125_v48, %v125_v48 }
 0x169   :  { %v2087_v11 = vpop.eup %2086 }
 0x16a   :  { %v132_v46 = vmul.f32 %v124_v30, %v124_v30  ;;  %v199_v26 = vadd.f32 %v2087_v11, %v2085_v10  ;;  %2092 = vpow2.f32 %v191_v4  ;;  %v181_v36 = vmul.f32 %v2654_v52, %v133_v42  ;;  %v2089_v25 = vpop.eup %2088 }
 0x16b   :  { %2060 = vset.pattern.permute.xlu1 %v2400_v40  ;;  %v2922_v27 = vpop.permute.xlu1 %707  ;;  %v2924_v23 = vpop.permute.xlu0 %759  ;;  %v126_v40 = vsub.f32 %v2705_v9, %v2624_v43  ;;  %v364_v43 = vsub.f32 %v2651_v51, %v2732_v29  ;;  %2094 = vpow2.f32 %v302_v44  ;;  %v366_v30 = vsub.f32 %v2667_v56, %v2742_v34 }
 0x16c   :  { %1159 = vperm.xlu1 %2060, %v2436_v1   ;;  %2062 = vset.pattern.permute.xlu0 %v3678_v55  ;;  %v180_v39 = vmul.f32 %v2648_v50, %v132_v46  ;;  %v252_v50 = vsub.f32 %v2699_v5, %v2692_v2  ;;  %2096 = vpow2.f32 %v304_v63  ;;  %v200_v48 = vadd.f32 %v2089_v25, %v199_v26 }
 0x16d   :  { %1277 = vperm.xlu0 %2062, %v2436_v1   ;;  %v249_v1 = vsub.f32 %v2673_v58, %v2676_v59  ;;  %v134_v49 = vmul.f32 %v126_v40, %v126_v40  ;;  %v372_v52 = vmul.f32 %v364_v43, %v364_v43  ;;  %v195_v40 = vmul.f32 1.442695, %v181_v36 }
 0x16e   :  { %v259_v10 = vmul.f32 %v251_v47, %v251_v47  ;;  %v373_v34 = vmul.f32 %v365_v60, %v365_v60  ;;  %v260_v46 = vmul.f32 %v252_v50, %v252_v50  ;;  %v374_v42 = vmul.f32 %v366_v30, %v366_v30  ;;  %v3744_v60 = vld [vmem:[#allocation6_spill] sm:$0xff] }
 0x16f   :  { %v2939_v7 = vpop.permute.xlu1 %715  ;;  %v182_v29 = vmul.f32 %v2657_v53, %v134_v49  ;;  %v257_v18 = vmul.f32 %v249_v1, %v249_v1  ;;  %v258_v53 = vmul.f32 %v250_v15, %v250_v15  ;;  %v3738_v1 = vld [vmem:[#allocation13_spill] sm:$0xff]  ;;  %v375_v11 = vmul.f32 %v367_v31, %v367_v31  ;;  %v3739_v49 = vld [vmem:[#allocation8_spill] sm:$0xff] }
 0x170   :  { %1167 = vperm.xlu1 %2060, %v2454_v6   ;;  %v2942_v41 = vpop.permute.xlu0 %805  ;;  %v296_v6 = vmul.f32 %v2711_v13, %v256_v22  ;;  %v412_v43 = vmul.f32 %v3738_v1, %v372_v52  ;;  %v3740_v15 = vld [vmem:[#allocation12_spill] sm:$0xff] }
 0x171   :  { %1289 = vperm.xlu0 %2062, %v2463_v8   ;;  %v297_v57 = vmul.f32 %v2717_v17, %v257_v18  ;;  %v197_v2 = vmul.f32 1.442695, %v182_v29  ;;  %v298_v22 = vmul.f32 %v2719_v19, %v258_v53  ;;  %v2091_v17 = vpop.eup %2090  ;;  %v369_v19 = vsub.f32 %v2689_v0, %v3739_v49  ;;  %v3743_v29 = vld [vmem:[#allocation5_spill] sm:$0xff]  ;;  %v3745_v53 = vld [vmem:[#allocation10_spill] sm:$0xff] }
 0x172   :  { %v306_v62 = vmul.f32 1.442695, %v296_v6  ;;  %v413_v63 = vmul.f32 %v3740_v15, %v373_v34  ;;  %v3741_v6 = vld [vmem:[#allocation15_spill] sm:$0xff]  ;;  %v299_v47 = vmul.f32 %v3743_v29, %v259_v10  ;;  %v300_v18 = vmul.f32 %v3744_v60, %v260_v46  ;;  %v3748_v49 = vld [vmem:[#allocation9_spill] sm:$0xff] }
 0x173   :  { %v2954_v59 = vpop.permute.xlu1 %739  ;;  %v414_v26 = vmul.f32 %v3741_v6, %v374_v42  ;;  %v310_v25 = vmul.f32 1.442695, %v298_v22  ;;  %v2997_v30 = vadd.f32 %v2091_v17, %v200_v48  ;;  %v420_v31 = vmul.f32 1.442695, %v412_v43  ;;  %v3746_v22 = vld [vmem:[#allocation14_spill] sm:$0xff]  ;;  %v3747_v42 = vld [vmem:[#allocation21_spill] sm:$0xff] }
 0x174   :  { %1171 = vperm.xlu1 %2060, %v2463_v8   ;;  %v2962_v13 = vpop.permute.xlu0 %817  ;;  %v193_v8 = vmul.f32 1.442695, %v180_v39  ;;  %2098 = vpow2.f32 %v306_v62  ;;  %v3742_v39 = vld [vmem:[#allocation20_spill] sm:$0xff]  ;;  %v2995_v52 = vpop.eup %2092  ;;  %v371_v62 = vsub.f32 %v2705_v9, %v3745_v53  ;;  %v422_v10 = vmul.f32 1.442695, %v413_v63  ;;  %v3750_v6 = vld [vmem:[#allocation11_spill] sm:$0xff] }
 0x175   :  { %1297 = vperm.xlu0 %2062, %v2481_v12   ;;  %v483_v3 = vsub.f32 %v2659_v54, %v3742_v39  ;;  %v415_v34 = vmul.f32 %v3746_v22, %v375_v11  ;;  %v482_v48 = vsub.f32 %v2651_v51, %v3747_v42  ;;  %v312_v17 = vmul.f32 1.442695, %v299_v47  ;;  %v3752_v47 = vld [vmem:[#allocation22_spill] sm:$0xff]  ;;  %v3753_v60 = vld [vmem:[#allocation31_spill] sm:$0xff] }
 0x176   :  { %2100 = vpow2.f32 %v193_v8  ;;  %v2095_v8 = vpop.eup %2094  ;;  %v314_v43 = vmul.f32 1.442695, %v300_v18  ;;  %v368_v15 = vsub.f32 %v2683_v61, %v3748_v49 }
 0x177   :  { %v2972_v4 = vpop.permute.xlu1 %747  ;;  %2102 = vpow2.f32 %v195_v40  ;;  %v261_v40 = vmul.f32 %v253_v33, %v253_v33  ;;  %v491_v46 = vmul.f32 %v483_v3, %v483_v3  ;;  %v426_v39 = vmul.f32 1.442695, %v415_v34  ;;  %v3751_v3 = vld [vmem:[#allocation16_spill] sm:$0xff] }
 0x178   :  { %1179 = vperm.xlu1 %2060, %v2481_v12   ;;  %v2976_v44 = vpop.permute.xlu0 %825  ;;  %v308_v12 = vmul.f32 1.442695, %v297_v57  ;;  %2104 = vpow2.f32 %v197_v2  ;;  %v377_v57 = vmul.f32 %v369_v19, %v369_v19  ;;  %v2097_v2 = vpop.eup %2096  ;;  %v3749_v19 = vld [vmem:[#allocation7_spill] sm:$0xff]  ;;  %v490_v29 = vmul.f32 %v482_v48, %v482_v48 }
 0x179   :  { %1305 = vperm.xlu0 %2062, %v2499_v16   ;;  %v318_v11 = vadd.f32 %v2097_v2, %v2095_v8  ;;  %v301_v63 = vmul.f32 %v3749_v19, %v261_v40  ;;  %v531_v18 = vmul.f32 %v3753_v60, %v491_v46  ;;  %v3755_v40 = vld [vmem:[#allocation24_spill] sm:$0xff]  ;;  %v3756_v46 = vld [vmem:[#allocation26_spill] sm:$0xff]  ;;  %v3760_v60 = vld [vmem:[#allocation25_spill] sm:$0xff] }
 0x17a   :  { %2106 = vpow2.f32 %v308_v12  ;;  %v379_v12 = vmul.f32 %v371_v62, %v371_v62  ;;  %v376_v62 = vmul.f32 %v368_v15, %v368_v15  ;;  %v488_v22 = vsub.f32 %v2699_v5, %v3755_v40  ;;  %v3757_v15 = vld [vmem:[#allocation17_spill] sm:$0xff]  ;;  %v3762_v40 = vld [vmem:[#allocation27_spill] sm:$0xff] }
 0x17b   :  { %v2988_v36 = vpop.permute.xlu1 %755  ;;  %2108 = vpow2.f32 %v310_v25  ;;  %v417_v25 = vmul.f32 %v3751_v3, %v377_v57  ;;  %v316_v42 = vmul.f32 1.442695, %v301_v63  ;;  %v530_v48 = vmul.f32 %v3756_v46, %v490_v29  ;;  %v3761_v63 = vld [vmem:[#allocation19_spill] sm:$0xff]  ;;  %v3763_v46 = vld [vmem:[#allocation28_spill] sm:$0xff] }
 0x17c   :  { %1187 = vperm.xlu1 %2060, %v2499_v16   ;;  %v2993_v50 = vpop.permute.xlu0 %833  ;;  %v424_v16 = vmul.f32 1.442695, %v414_v26  ;;  %2110 = vpow2.f32 %v420_v31  ;;  %v370_v26 = vsub.f32 %v2699_v5, %v3750_v6  ;;  %v3754_v31 = vld [vmem:[#allocation23_spill] sm:$0xff]  ;;  %v416_v19 = vmul.f32 %v3757_v15, %v376_v62  ;;  %v3759_v6 = vld [vmem:[#allocation18_spill] sm:$0xff] }
 0x17d   :  { %1329 = vperm.xlu0 %2062, %v2517_v20   ;;  %2112 = vpow2.f32 %v422_v10  ;;  %v484_v8 = vsub.f32 %v2667_v56, %v3754_v31  ;;  %v430_v49 = vmul.f32 1.442695, %v417_v25  ;;  %v419_v3 = vmul.f32 %v3759_v6, %v379_v12 }
 0x17e   :  { %2114 = vpow2.f32 %v424_v16  ;;  %v2099_v53 = vpop.eup %2098  ;;  %v496_v31 = vmul.f32 %v488_v22, %v488_v22  ;;  %v202_v12 = vadd.f32 %v2995_v52, %v2997_v30  ;;  %v428_v22 = vmul.f32 1.442695, %v416_v19  ;;  %v3765_v52 = vld [vmem:[#allocation32_spill] sm:$0xff]  ;;  %v3766_v19 = vld [vmem:[#allocation29_spill] sm:$0xff] }
 0x17f   :  { %v3005_v1 = vpop.permute.xlu1 %763  ;;  %2116 = vpow2.f32 %v312_v17  ;;  %v319_v16 = vadd.f32 %v2099_v53, %v318_v11  ;;  %v378_v17 = vmul.f32 %v370_v26, %v370_v26  ;;  %v540_v11 = vmul.f32 1.442695, %v531_v18 }
 0x180   :  { %1211 = vperm.xlu1 %2060, %v2517_v20   ;;  %v3010_v33 = vpop.permute.xlu0 %857  ;;  %v486_v20 = vsub.f32 %v2683_v61, %v3752_v47  ;;  %v2101_v34 = vpop.eup %2100  ;;  %2118 = vpow2.f32 %v314_v43  ;;  %v485_v43 = vsub.f32 %v2673_v58, %v3760_v60  ;;  %v492_v53 = vmul.f32 %v484_v8, %v484_v8  ;;  %v3764_v60 = vld [vmem:[#allocation30_spill] sm:$0xff] }
 0x181   :  { %1337 = vperm.xlu0 %2062, %v2535_v24   ;;  %v3031_v2 = vpop.eup %2102  ;;  %2120 = vpow2.f32 %v426_v39  ;;  %v418_v29 = vmul.f32 %v3761_v63, %v378_v17  ;;  %v487_v26 = vsub.f32 %v2689_v0, %v3762_v40  ;;  %v434_v6 = vmul.f32 1.442695, %v419_v3 }
 0x182   :  { %v494_v47 = vmul.f32 %v486_v20, %v486_v20  ;;  %2122 = vpow2.f32 %v316_v42  ;;  %v538_v20 = vmul.f32 1.442695, %v530_v48  ;;  %v532_v17 = vmul.f32 %v3763_v46, %v492_v53 }
 0x183   :  { %2124 = vpow2.f32 %v540_v11  ;;  %v432_v55 = vmul.f32 1.442695, %v418_v29  ;;  %v536_v30 = vmul.f32 %v3765_v52, %v496_v31  ;;  %v489_v3 = vsub.f32 %v2705_v9, %v3766_v19  ;;  %v3768_v11 = vld [vmem:[#allocation39_spill] sm:$0xff] }
 0x184   :  { %1219 = vperm.xlu1 %2060, %v2535_v24   ;;  %v3025_v10 = vpop.permute.xlu1 %809  ;;  %v3027_v57 = vpop.permute.xlu0 %865  ;;  %v534_v63 = vmul.f32 %v3764_v60, %v494_v47  ;;  %2126 = vpow2.f32 %v430_v49  ;;  %v601_v49 = vsub.f32 %v2659_v54, %v3768_v11  ;;  %v3679_v29 = vmov 11  }
 0x185   :  { %1345 = vperm.xlu0 %2062, %v2553_v28   ;;  %v3034_v24 = vpop.eup %2104  ;;  %2128 = vpow2.f32 %v538_v20  ;;  %v542_v31 = vmul.f32 1.442695, %v532_v17  ;;  %v3070_v20 = vld [vmem:[%s3675_s1 + $0x8] sm:$0xff] }
 0x186   :  { %3758 = vst [vmem:[#allocation13_spill] sm:$0xff] %v3034_v24  ;;  %v2107_v62 = vpop.eup %2106  ;;  %v495_v24 = vmul.f32 %v487_v26, %v487_v26  ;;  %2130 = vpow2.f32 %v428_v22  ;;  %v3770_v26 = vld [vmem:[#allocation35_spill] sm:$0xff]  ;;  %3771 = vst [vmem:[#allocation12_spill] sm:$0xff] %v3070_v20  ;;  %v546_v60 = vmul.f32 1.442695, %v534_v63  ;;  %v3773_v22 = vld [vmem:[#allocation36_spill] sm:$0xff] }
 0x187   :  { %v2109_v18 = vpop.eup %2108  ;;  %v320_v8 = vadd.f32 %v2107_v62, %v319_v16  ;;  %2132 = vpow2.f32 %v434_v6  ;;  %v603_v17 = vsub.f32 %v2673_v58, %v3773_v22  ;;  %v3093_v63 = vld [vmem:[%s3675_s1 + $0x20] sm:$0xff] }
 0x188   :  { %1227 = vperm.xlu1 %2060, %v2553_v28   ;;  %v3043_v39 = vpop.permute.xlu1 %813  ;;  %v3045_v25 = vpop.permute.xlu0 %873  ;;  %v493_v28 = vmul.f32 %v485_v43, %v485_v43  ;;  %v3767_v43 = vld [vmem:[#allocation33_spill] sm:$0xff]  ;;  %v535_v62 = vmul.f32 %v3770_v26, %v495_v24  ;;  %2134 = vpow2.f32 %v432_v55  ;;  %v3774_v24 = vmov 10   ;;  %v3775_v26 = vld [vmem:[#allocation34_spill] sm:$0xff]  ;;  %3777 = vst [vmem:[#allocation5_spill] sm:$0xff] %v3093_v63 }
 0x189   :  { %1353 = vperm.xlu0 %2062, %v2571_v32   ;;  %v2111_v15 = vpop.eup %2110  ;;  %2136 = vpow2.f32 %v542_v31 }
 0x18a   :  { %v2113_v40 = vpop.eup %2112  ;;  %v533_v47 = vmul.f32 %v3767_v43, %v493_v28  ;;  %v203_v28 = vadd.f32 %v2101_v34, %v202_v12  ;;  %v497_v43 = vmul.f32 %v489_v3, %v489_v3  ;;  %v3088_v12 = vadd.f32 %v2109_v18, %v320_v8 }
 0x18b   :  { %v2115_v48 = vpop.eup %2114  ;;  %v548_v6 = vmul.f32 1.442695, %v535_v62  ;;  %2138 = vpow2.f32 %v546_v60  ;;  %v718_v18 = vsub.f32 %v2651_v51, %v2893_v14  ;;  %v3782_v60 = vld [vmem:[#allocation42_spill] sm:$0xff]  ;;  %v3113_v14 = vld [vmem:[%s3675_s1 + $0x10] sm:$0xff] }
 0x18c   :  { %1235 = vperm.xlu1 %2060, %v2571_v32   ;;  %v3054_v42 = vpop.permute.xlu1 %821  ;;  %v3056_v16 = vpop.permute.xlu0 %881  ;;  %v436_v32 = vadd.f32 %v2113_v40, %v2111_v15  ;;  %v550_v15 = vmul.f32 1.442695, %v536_v30  ;;  %v544_v11 = vmul.f32 1.442695, %v533_v47  ;;  %v3086_v55 = vadd.f32 %v3031_v2, %v203_v28  ;;  %v3780_v47 = vld [vmem:[#allocation50_spill] sm:$0xff] }
 0x18d   :  { %2065 = vset.pattern.permute.xlu0 %v3679_v29  ;;  %v3064_v53 = vpop.eup %2116  ;;  %v600_v29 = vsub.f32 %v2651_v51, %v3775_v26  ;;  %v719_v2 = vsub.f32 %v2659_v54, %v3780_v47 }
 0x18e   :  { %3769 = vst [vmem:[#allocation8_spill] sm:$0xff] %v3064_v53  ;;  %1399 = vperm.xlu0 %2065, %v3070_v20   ;;  %v3073_v46 = vpop.eup %2118  ;;  %v437_v19 = vadd.f32 %v2115_v48, %v436_v32  ;;  %3776 = vst [vmem:[#allocation20_spill] sm:$0xff] %v3086_v55  ;;  %v3779_v48 = vld [vmem:[#allocation37_spill] sm:$0xff]  ;;  %2140 = vpow2.f32 %v550_v15  ;;  %v3784_v15 = vld [vmem:[#allocation38_spill] sm:$0xff] }
 0x18f   :  { %3772 = vst [vmem:[#allocation15_spill] sm:$0xff] %v3073_v46  ;;  %v2121_v52 = vpop.eup %2120  ;;  %v609_v46 = vmul.f32 %v601_v49, %v601_v49  ;;  %v537_v3 = vmul.f32 %v3779_v48, %v497_v43  ;;  %v611_v49 = vmul.f32 %v603_v17, %v603_v17  ;;  %v3781_v32 = vld [vmem:[#allocation41_spill] sm:$0xff]  ;;  %2142 = vpow2.f32 %v544_v11  ;;  %v3785_v17 = vld [vmem:[#allocation44_spill] sm:$0xff] }
 0x190   :  { %2063 = vset.pattern.permute.xlu1 %v3774_v24  ;;  %v3078_v40 = vpop.permute.xlu1 %829  ;;  %v3096_v30 = vpop.eup %2122  ;;  %v3103_v8 = vadd.f32 %v2121_v52, %v437_v19  ;;  %v602_v31 = vsub.f32 %v2667_v56, %v3781_v32  ;;  %v608_v22 = vmul.f32 %v600_v29, %v600_v29  ;;  %v837_v43 = vsub.f32 %v2659_v54, %v3025_v10  ;;  %v3128_v11 = vld [vmem:[%s3675_s1 + $0x30] sm:$0xff] }
 0x191   :  { %1281 = vperm.xlu1 %2063, %v3070_v20   ;;  %v3083_v34 = vpop.permute.xlu0 %927  ;;  %3778 = vst [vmem:[#allocation6_spill] sm:$0xff] %v3096_v30  ;;  %v2125_v28 = vpop.eup %2124  ;;  %v649_v24 = vmul.f32 %v3782_v60, %v609_v46  ;;  %2144 = vpow2.f32 %v548_v6  ;;  %v605_v29 = vsub.f32 %v2689_v0, %v3784_v15  ;;  %v651_v46 = vmul.f32 %v3785_v17, %v611_v49 }
 0x192   :  { %1411 = vperm.xlu0 %2065, %v3093_v63   ;;  %v3118_v19 = vpop.eup %2126  ;;  %v836_v10 = vsub.f32 %v2651_v51, %v2942_v41  ;;  %3786 = vst [vmem:[#allocation14_spill] sm:$0xff] %v3128_v11  ;;  %v552_v48 = vmul.f32 1.442695, %v537_v3  ;;  %v727_v47 = vmul.f32 %v719_v2, %v719_v2  ;;  %v726_v32 = vmul.f32 %v718_v18, %v718_v18  ;;  %v3787_v41 = vld [vmem:[#allocation47_spill] sm:$0xff] }
 0x193   :  { %3783 = vst [vmem:[#allocation10_spill] sm:$0xff] %v3118_v19  ;;  %v2129_v26 = vpop.eup %2128  ;;  %v720_v6 = vsub.f32 %v2667_v56, %v2903_v37  ;;  %v610_v15 = vmul.f32 %v602_v31, %v602_v31  ;;  %v648_v17 = vmul.f32 %v3787_v41, %v608_v22  ;;  %v838_v20 = vsub.f32 %v2667_v56, %v3043_v39  ;;  %v3789_v3 = vld [vmem:[#allocation43_spill] sm:$0xff]  ;;  %v3791_v41 = vld [vmem:[#allocation49_spill] sm:$0xff] }
 0x194   :  { %v854_v62 = vpop.permute.xlu1 %853  ;;  %v3133_v60 = vpop.eup %2130  ;;  %v3135_v49 = vadd.f32 %v2129_v26, %v2125_v28  ;;  %v658_v19 = vmul.f32 1.442695, %v649_v24  ;;  %v604_v2 = vsub.f32 %v2683_v61, %v3789_v3  ;;  %v767_v18 = vmul.f32 %v2954_v59, %v727_v47  ;;  %v3154_v24 = vld [vmem:[%s3676_s2] sm:$0xff] }
 0x195   :  { %1285 = vperm.xlu1 %2063, %v3113_v14   ;;  %v3116_v52 = vpop.permute.xlu0 %939  ;;  %v3140_v30 = vpop.eup %2132  ;;  %v845_v37 = vmul.f32 %v837_v43, %v837_v43  ;;  %v613_v22 = vmul.f32 %v605_v29, %v605_v29  ;;  %v662_v26 = vmul.f32 1.442695, %v651_v46  ;;  %v650_v39 = vmul.f32 %v3791_v41, %v610_v15  ;;  %v3792_v29 = vld [vmem:[#allocation40_spill] sm:$0xff] }
 0x196   :  { %1419 = vperm.xlu0 %2065, %v3128_v11   ;;  %3788 = vst [vmem:[#allocation21_spill] sm:$0xff] %v3140_v30  ;;  %v3148_v31 = vpop.eup %2134  ;;  %v844_v53 = vmul.f32 %v836_v10, %v836_v10  ;;  %2146 = vpow2.f32 %v552_v48  ;;  %v766_v59 = vmul.f32 %v2895_v35, %v726_v32  ;;  %v728_v43 = vmul.f32 %v720_v6, %v720_v6 }
 0x197   :  { %3790 = vst [vmem:[#allocation9_spill] sm:$0xff] %v3148_v31  ;;  %v721_v47 = vsub.f32 %v2673_v58, %v2913_v38  ;;  %v3160_v3 = vpop.eup %2136  ;;  %v607_v46 = vsub.f32 %v2705_v9, %v3792_v29  ;;  %v656_v10 = vmul.f32 1.442695, %v648_v17  ;;  %v846_v15 = vmul.f32 %v838_v20, %v838_v20 }
 0x198   :  { %v862_v55 = vpop.permute.xlu1 %861  ;;  %v884_v41 = vmul.f32 %v854_v62, %v844_v53  ;;  %v3164_v31 = vpop.eup %2138  ;;  %2148 = vpow2.f32 %v658_v19  ;;  %v612_v30 = vmul.f32 %v604_v2, %v604_v2  ;;  %v776_v48 = vmul.f32 1.442695, %v767_v18  ;;  %v3177_v62 = vld [vmem:[%s3676_s2 + $0x10] sm:$0xff]  ;;  %v3794_v19 = vld [vmem:[#allocation46_spill] sm:$0xff] }
 0x199   :  { %1293 = vperm.xlu1 %2063, %v3093_v63   ;;  %v3146_v28 = vpop.permute.xlu0 %947  ;;  %v885_v35 = vmul.f32 %v3010_v33, %v845_v37  ;;  %v3170_v38 = vpop.eup %2140  ;;  %2150 = vpow2.f32 %v662_v26  ;;  %v660_v6 = vmul.f32 1.442695, %v650_v39  ;;  %v839_v20 = vsub.f32 %v2673_v58, %v2962_v13  ;;  %v3795_v13 = vld [vmem:[#allocation51_spill] sm:$0xff] }
 0x19a   :  { %1443 = vperm.xlu0 %2065, %v3154_v24   ;;  %3793 = vst [vmem:[#allocation7_spill] sm:$0xff] %v3170_v38  ;;  %v886_v53 = vmul.f32 %v862_v55, %v846_v15  ;;  %v3180_v33 = vpop.eup %2142  ;;  %v653_v17 = vmul.f32 %v3794_v19, %v613_v22  ;;  %v774_v2 = vmul.f32 1.442695, %v766_v59  ;;  %v768_v18 = vmul.f32 %v2905_v45, %v728_v43 }
 0x19b   :  { %v729_v37 = vmul.f32 %v721_v47, %v721_v47  ;;  %v3184_v26 = vpop.eup %2144  ;;  %2152 = vpow2.f32 %v656_v10  ;;  %v652_v55 = vmul.f32 %v3795_v13, %v612_v30  ;;  %v840_v39 = vsub.f32 %v2683_v61, %v3054_v42  ;;  %v3202_v47 = vld [vmem:[%s3676_s2 + $0x20] sm:$0xff] }
 0x19c   :  { %v870_v63 = vpop.permute.xlu1 %869  ;;  %v892_v29 = vmul.f32 1.442695, %v884_v41  ;;  %2154 = vpow2.f32 %v776_v48  ;;  %v894_v59 = vmul.f32 1.442695, %v885_v35  ;;  %v723_v30 = vsub.f32 %v2689_v0, %v2922_v27 }
 0x19d   :  { %1301 = vperm.xlu1 %2063, %v3128_v11   ;;  %v3168_v32 = vpop.permute.xlu0 %971  ;;  %v3796_v11 = vld [vmem:[#allocation52_spill] sm:$0xff]  ;;  %v769_v22 = vmul.f32 %v2972_v4, %v729_v37  ;;  %2156 = vpow2.f32 %v660_v6  ;;  %v847_v43 = vmul.f32 %v839_v20, %v839_v20  ;;  %v896_v42 = vmul.f32 1.442695, %v886_v53  ;;  %v3797_v4 = vld [vmem:[#allocation45_spill] sm:$0xff] }
 0x19e   :  { %1451 = vperm.xlu0 %2065, %v3177_v62   ;;  %v722_v38 = vsub.f32 %v2683_v61, %v3796_v11  ;;  %v615_v11 = vmul.f32 %v607_v46, %v607_v46  ;;  %v606_v10 = vsub.f32 %v2699_v5, %v3797_v4  ;;  %2158 = vpow2.f32 %v774_v2 }
 0x19f   :  { %v778_v41 = vmul.f32 1.442695, %v768_v18  ;;  %v666_v48 = vmul.f32 1.442695, %v653_v17  ;;  %v887_v35 = vmul.f32 %v3027_v57, %v847_v43  ;;  %v848_v6 = vmul.f32 %v840_v39, %v840_v39  ;;  %v3218_v57 = vld [vmem:[%s3676_s2 + $0x30] sm:$0xff]  ;;  %v3799_v43 = vld [vmem:[#allocation54_spill] sm:$0xff] }
 0x1a0   :  { %v3189_v15 = vpop.permute.xlu1 %877  ;;  %2160 = vpow2.f32 %v892_v29  ;;  %v3208_v27 = vpop.eup %2146  ;;  %v664_v20 = vmul.f32 1.442695, %v652_v55  ;;  %v730_v53 = vmul.f32 %v722_v38, %v722_v38  ;;  %v780_v19 = vmul.f32 1.442695, %v769_v22 }
 0x1a1   :  { %1325 = vperm.xlu1 %2063, %v3154_v24   ;;  %v3195_v45 = vpop.permute.xlu0 %979  ;;  %2162 = vpow2.f32 %v894_v59  ;;  %v731_v13 = vmul.f32 %v723_v30, %v723_v30  ;;  %v841_v2 = vsub.f32 %v2689_v0, %v2976_v44  ;;  %v888_v17 = vmul.f32 %v870_v63, %v848_v6  ;;  %v3798_v59 = vld [vmem:[#allocation48_spill] sm:$0xff] }
 0x1a2   :  { %1459 = vperm.xlu0 %2065, %v3202_v47   ;;  %2164 = vpow2.f32 %v896_v42  ;;  %v2149_v38 = vpop.eup %2148  ;;  %v770_v18 = vmul.f32 %v2915_v21, %v730_v53  ;;  %v725_v55 = vsub.f32 %v2705_v9, %v2939_v7  ;;  %v898_v63 = vmul.f32 1.442695, %v887_v35 }
 0x1a3   :  { %2166 = vpow2.f32 %v778_v41  ;;  %v3224_v39 = vpop.eup %2150  ;;  %v771_v44 = vmul.f32 %v2988_v36, %v731_v13  ;;  %v842_v29 = vsub.f32 %v2699_v5, %v3078_v40  ;;  %v614_v22 = vmul.f32 %v606_v10, %v606_v10  ;;  %v3800_v10 = vld [vmem:[#allocation53_spill] sm:$0xff]  ;;  %v3244_v13 = vld [vmem:[%s3675_s1] sm:$0xff] }
 0x1a4   :  { %2168 = vpow2.f32 %v666_v48  ;;  %v655_v30 = vmul.f32 %v3798_v59, %v615_v11  ;;  %v724_v42 = vsub.f32 %v2699_v5, %v3799_v43  ;;  %v555_v36 = vadd.f32 %v3160_v3, %v3135_v49 }
 0x1a5   :  { %1333 = vperm.xlu1 %2063, %v3177_v62   ;;  %v924_v37 = vpop.permute.xlu1 %923  ;;  %v3211_v46 = vpop.permute.xlu0 %987  ;;  %2170 = vpow2.f32 %v780_v19  ;;  %v849_v41 = vmul.f32 %v841_v2, %v841_v2  ;;  %v900_v48 = vmul.f32 1.442695, %v888_v17  ;;  %v3686_v40 = vmov 12  }
 0x1a6   :  { %1467 = vperm.xlu0 %2065, %v3218_v57   ;;  %v2153_v4 = vpop.eup %2152  ;;  %2172 = vpow2.f32 %v664_v20  ;;  %v654_v35 = vmul.f32 %v3800_v10, %v614_v22  ;;  %v782_v6 = vmul.f32 1.442695, %v770_v18  ;;  %v733_v53 = vmul.f32 %v725_v55, %v725_v55 }
 0x1a7   :  { %v2155_v11 = vpop.eup %2154  ;;  %v843_v19 = vsub.f32 %v2705_v9, %v2993_v50  ;;  %v784_v3 = vmul.f32 1.442695, %v771_v44  ;;  %2174 = vpow2.f32 %v898_v63  ;;  %v889_v20 = vmul.f32 %v3045_v25, %v849_v41 }
 0x1a8   :  { %v2157_v49 = vpop.eup %2156  ;;  %v850_v2 = vmul.f32 %v842_v29, %v842_v29  ;;  %v670_v22 = vmul.f32 1.442695, %v655_v30  ;;  %v732_v18 = vmul.f32 %v724_v42, %v724_v42  ;;  %v773_v55 = vmul.f32 %v3005_v1, %v733_v53 }
 0x1a9   :  { %1341 = vperm.xlu1 %2063, %v3202_v47   ;;  %v932_v21 = vpop.permute.xlu1 %931  ;;  %v3233_v7 = vpop.permute.xlu0 %995  ;;  %v954_v50 = vsub.f32 %v2651_v51, %v924_v37  ;;  %v672_v10 = vadd.f32 %v2153_v4, %v2149_v38  ;;  %2176 = vpow2.f32 %v900_v48  ;;  %v668_v29 = vmul.f32 1.442695, %v654_v35  ;;  %v3260_v37 = vld [vmem:[%s3675_s1 + $0x18] sm:$0xff] }
 0x1aa   :  { %2066 = vset.pattern.permute.xlu0 %v3686_v40  ;;  %v2159_v17 = vpop.eup %2158  ;;  %v890_v44 = vmul.f32 %v3189_v15, %v850_v2  ;;  %2178 = vpow2.f32 %v782_v6  ;;  %v772_v30 = vmul.f32 %v2924_v23, %v732_v18  ;;  %v851_v1 = vmul.f32 %v843_v19, %v843_v19 }
 0x1ab   :  { %1513 = vperm.xlu0 %2066, %v3244_v13   ;;  %v2161_v43 = vpop.eup %2160  ;;  %v790_v40 = vadd.f32 %v2159_v17, %v2155_v11  ;;  %v673_v42 = vadd.f32 %v2157_v49, %v672_v10  ;;  %2180 = vpow2.f32 %v784_v3  ;;  %v902_v4 = vmul.f32 1.442695, %v889_v20 }
 0x1ac   :  { %v2163_v25 = vpop.eup %2162  ;;  %v956_v15 = vsub.f32 %v2667_v56, %v932_v21  ;;  %v788_v48 = vmul.f32 1.442695, %v773_v55  ;;  %v891_v11 = vmul.f32 %v3056_v16, %v851_v1  ;;  %v962_v23 = vmul.f32 %v954_v50, %v954_v50  ;;  %v3279_v55 = vld [vmem:[%s3675_s1 + $0x28] sm:$0xff]  ;;  %v3804_v1 = vld [vmem:[#allocation10_spill] sm:$0xff] }
 0x1ad   :  { %1349 = vperm.xlu1 %2063, %v3218_v57   ;;  %v3251_v59 = vpop.permute.xlu1 %935  ;;  %v2165_v38 = vpop.eup %2164  ;;  %v908_v35 = vadd.f32 %v2163_v25, %v2161_v43  ;;  %v3801_v6 = vmov 11   ;;  %v556_v2 = vadd.f32 %v3180_v33, %v555_v36  ;;  %2182 = vpow2.f32 %v670_v22 }
 0x1ae   :  { %v3254_v63 = vpop.permute.xlu0 %1041  ;;  %v2167_v41 = vpop.eup %2166  ;;  %v904_v3 = vmul.f32 1.442695, %v890_v44  ;;  %v439_v16 = vadd.f32 %v3133_v60, %v3103_v8  ;;  %2184 = vpow2.f32 %v668_v29  ;;  %v786_v17 = vmul.f32 1.442695, %v772_v30  ;;  %v3802_v44 = vld [vmem:[#allocation13_spill] sm:$0xff]  ;;  %v3803_v30 = vld [vmem:[#allocation8_spill] sm:$0xff] }
 0x1af   :  { %1525 = vperm.xlu0 %2066, %v3260_v37   ;;  %v3268_v19 = vpop.eup %2168  ;;  %v791_v49 = vadd.f32 %v2167_v41, %v790_v40  ;;  %v909_v18 = vadd.f32 %v2165_v38, %v908_v35  ;;  %v674_v36 = vadd.f32 %v3224_v39, %v673_v42  ;;  %2186 = vpow2.f32 %v902_v4  ;;  %v3304_v42 = vld [vmem:[%s3675_s1 + $0x38] sm:$0xf] }
 0x1b0   :  { %v2171_v20 = vpop.eup %2170  ;;  %v955_v40 = vsub.f32 %v2659_v54, %v3083_v34  ;;  %v964_v22 = vmul.f32 %v956_v15, %v956_v15  ;;  %2188 = vpow2.f32 %v788_v48  ;;  %v906_v8 = vmul.f32 1.442695, %v891_v11 }
 0x1b1   :  { %2064 = vset.pattern.permute.xlu1 %v3801_v6  ;;  %v3266_v53 = vpop.permute.xlu1 %943  ;;  %v2173_v33 = vpop.eup %2172  ;;  %v958_v60 = vsub.f32 %v2683_v61, %v3116_v52  ;;  %v1002_v50 = vmul.f32 %v3168_v32, %v962_v23  ;;  %v3292_v25 = vsel %vm205_vm0, %v3802_v44, 0.0  ;;  %v557_v39 = vadd.f32 %v3164_v31, %v556_v2 }
 0x1b2   :  { %1395 = vperm.xlu1 %2064, %v3244_v13   ;;  %v3272_v21 = vpop.permute.xlu0 %1053  ;;  %v2175_v10 = vpop.eup %2174  ;;  %v792_v29 = vadd.f32 %v2171_v20, %v791_v49  ;;  %2190 = vpow2.f32 %v904_v3  ;;  %v322_v52 = vadd.f32 %v3803_v30, %v3088_v12  ;;  %v440_v32 = vadd.f32 %v3804_v1, %v439_v16  ;;  %v3805_v49 = vld [vmem:[#allocation6_spill] sm:$0xff] }
 0x1b3   :  { %1533 = vperm.xlu0 %2066, %v3279_v55   ;;  %2192 = vpow2.f32 %v786_v17  ;;  %v910_v38 = vadd.f32 %v2175_v10, %v909_v18  ;;  %v2177_v31 = vpop.eup %2176  ;;  %v675_v4 = vadd.f32 %v2173_v33, %v674_v36  ;;  %v963_v15 = vmul.f32 %v955_v40, %v955_v40  ;;  %v3807_v33 = vld [vmem:[#allocation21_spill] sm:$0xff] }
 0x1b4   :  { %v1004_v41 = vmul.f32 %v3195_v45, %v964_v22  ;;  %v957_v48 = vsub.f32 %v2673_v58, %v3251_v59  ;;  %v2179_v12 = vpop.eup %2178  ;;  %2194 = vpow2.f32 %v906_v8  ;;  %v966_v11 = vmul.f32 %v958_v60, %v958_v60  ;;  %v3806_v59 = vld [vmem:[#allocation15_spill] sm:$0xff]  ;;  %v3325_v22 = vld [vmem:[%s3676_s2 + $0x8] sm:$0xff] }
 0x1b5   :  { %v3288_v43 = vpop.permute.xlu1 %951  ;;  %v960_v35 = vsub.f32 %v2699_v5, %v3146_v28  ;;  %v1010_v23 = vmul.f32 1.442695, %v1002_v50  ;;  %v2181_v2 = vpop.eup %2180  ;;  %v324_v3 = vsel %vm205_vm0, %v3805_v49, 0.0  ;;  %v558_v20 = vadd.f32 %v3184_v26, %v557_v39  ;;  %v3808_v39 = vld [vmem:[#allocation9_spill] sm:$0xff] }
 0x1b6   :  { %1403 = vperm.xlu1 %2064, %v3113_v14   ;;  %v3296_v34 = vpop.permute.xlu0 %1061  ;;  %v793_v16 = vadd.f32 %v2179_v12, %v792_v29  ;;  %v323_v18 = vadd.f32 %v3806_v59, %v322_v52  ;;  %v442_v36 = vsel %vm205_vm0, %v3807_v33, 0.0  ;;  %v911_v28 = vadd.f32 %v2177_v31, %v910_v38  ;;  %v3809_v38 = vld [vmem:[#allocation7_spill] sm:$0xff] }
 0x1b7   :  { %1541 = vperm.xlu0 %2066, %v3304_v42   ;;  %v1006_v40 = vmul.f32 %v3211_v46, %v966_v11  ;;  %v2183_v26 = vpop.eup %2182  ;;  %v1014_v8 = vmul.f32 1.442695, %v1004_v41  ;;  %v965_v60 = vmul.f32 %v957_v48, %v957_v48  ;;  %v959_v50 = vsub.f32 %v2689_v0, %v3266_v53 }
 0x1b8   :  { %v2185_v44 = vpop.eup %2184  ;;  %v441_v29 = vadd.f32 %v3808_v39, %v440_v32  ;;  %v676_v30 = vadd.f32 %v3268_v19, %v675_v4  ;;  %v968_v46 = vmul.f32 %v960_v35, %v960_v35  ;;  %2196 = vpow2.f32 %v1010_v23  ;;  %v3342_v4 = vld [vmem:[%s3676_s2 + $0x18] sm:$0xff] }
 0x1b9   :  { %v976_v6 = vpop.permute.xlu1 %975  ;;  %v2187_v1 = vpop.eup %2186  ;;  %v559_v31 = vadd.f32 %v3809_v38, %v558_v20  ;;  %v560_v48 = vsel %vm205_vm0, %v3208_v27, 0.0  ;;  %v1018_v11 = vmul.f32 1.442695, %v1006_v40  ;;  %v967_v23 = vmul.f32 %v959_v50, %v959_v50  ;;  %v3810_v27 = vld [vmem:[#allocation20_spill] sm:$0xff] }
 0x1ba   :  { %v1003_v17 = vmul.f32 %v976_v6, %v963_v15  ;;  %1407 = vperm.xlu1 %2064, %v3260_v37   ;;  %v3316_v45 = vpop.permute.xlu0 %1069  ;;  %v794_v15 = vadd.f32 %v2181_v2, %v793_v16  ;;  %v2189_v53 = vpop.eup %2188  ;;  %v912_v32 = vadd.f32 %v2187_v1, %v911_v28  ;;  %v1008_v19 = vmul.f32 %v3233_v7, %v968_v46 }
 0x1bb   :  { %1565 = vperm.xlu0 %2066, %v3325_v22   ;;  %v961_v6 = vsub.f32 %v2705_v9, %v3288_v43  ;;  %v207_v20 = vadd.f32 %v3292_v25, %v3810_v27  ;;  %v325_v16 = vadd.f32 %v324_v3, %v323_v18  ;;  %v677_v7 = vadd.f32 %v2185_v44, %v676_v30  ;;  %v3357_v25 = vld [vmem:[%s3676_s2 + $0x28] sm:$0xff] }
 0x1bc   :  { %v1012_v10 = vmul.f32 1.442695, %v1003_v17  ;;  %v2191_v35 = vpop.eup %2190  ;;  %v443_v59 = vadd.f32 %v442_v36, %v441_v29  ;;  %v678_v43 = vsel %vm205_vm0, %v2183_v26, 0.0  ;;  %v796_v50 = vsel %vm205_vm0, %v2189_v53, 0.0 }
 0x1bd   :  { %v984_v52 = vpop.permute.xlu1 %983  ;;  %v2193_v49 = vpop.eup %2192  ;;  %v1022_v3 = vmul.f32 1.442695, %v1008_v19  ;;  %v969_v18 = vmul.f32 %v961_v6, %v961_v6  ;;  %v326_v44 = vrot.slane %v325_v16, 4  ;;  %v679_v39 = vadd.f32 %v678_v43, %v677_v7 }
 0x1be   :  { %2198 = vpow2.f32 %v1012_v10  ;;  %v1005_v12 = vmul.f32 %v984_v52, %v965_v60  ;;  %1415 = vperm.xlu1 %2064, %v3279_v55   ;;  %v3334_v41 = vpop.permute.xlu0 %1093  ;;  %v795_v33 = vadd.f32 %v2193_v49, %v794_v15  ;;  %v561_v60 = vadd.f32 %v560_v48, %v559_v31 }
 0x1bf   :  { %1573 = vperm.xlu0 %2066, %v3342_v4   ;;  %2200 = vpow2.f32 %v1014_v8  ;;  %v2195_v8 = vpop.eup %2194  ;;  %v913_v10 = vadd.f32 %v2191_v35, %v912_v32  ;;  %v208_v38 = vrot.slane %v207_v20, 4  ;;  %v444_v31 = vrot.slane %v443_v59, 4 }
 0x1c0   :  { %v1016_v2 = vmul.f32 1.442695, %v1005_v12  ;;  %v797_v30 = vadd.f32 %v796_v50, %v795_v33  ;;  %v914_v26 = vsel %vm205_vm0, %v2195_v8, 0.0  ;;  %v3367_v12 = vld [vmem:[%s3676_s2 + $0x38] sm:$0xf]  ;;  %v562_v48 = vrot.slane %v561_v60, 4 }
 0x1c1   :  { %v992_v17 = vpop.permute.xlu1 %991  ;;  %v915_v15 = vadd.f32 %v914_v26, %v913_v10  ;;  %v445_v27 = vadd.f32 %v444_v31, %v443_v59  ;;  %v3687_v33 = vmov 13   ;;  %v209_v8 = vadd.f32 %v208_v38, %v207_v20  ;;  %v3812_v50 = vld [vmem:[#allocation12_spill] sm:$0xff] }
 0x1c2   :  { %2202 = vpow2.f32 %v1016_v2  ;;  %v1007_v28 = vmul.f32 %v992_v17, %v967_v23  ;;  %1423 = vperm.xlu1 %2064, %v3304_v42   ;;  %v3350_v40 = vpop.permute.xlu0 %1101  ;;  %v2197_v1 = vpop.eup %2196  ;;  %v327_v23 = vadd.f32 %v326_v44, %v325_v16  ;;  %v798_v6 = vrot.slane %v797_v30, 4 }
 0x1c3   :  { %1581 = vperm.xlu0 %2066, %v3357_v25   ;;  %2204 = vpow2.f32 %v1018_v11  ;;  %v680_v11 = vrot.slane %v679_v39, 4  ;;  %v916_v7 = vrot.slane %v915_v15, 4  ;;  %v563_v43 = vadd.f32 %v562_v48, %v561_v60  ;;  %v3813_v60 = vld [vmem:[#allocation5_spill] sm:$0xff] }
 0x1c4   :  { %v1020_v36 = vmul.f32 1.442695, %v1007_v28  ;;  %v446_v59 = vrot.slane %v445_v27, 2  ;;  %v210_v31 = vrot.slane %v209_v8, 2 }
 0x1c5   :  { %v1000_v29 = vpop.permute.xlu1 %999  ;;  %v681_v16 = vadd.f32 %v680_v11, %v679_v39  ;;  %v564_v20 = vrot.slane %v563_v43, 2 }
 0x1c6   :  { %2206 = vpow2.f32 %v1020_v36  ;;  %v1009_v46 = vmul.f32 %v1000_v29, %v969_v18  ;;  %1447 = vperm.xlu1 %2064, %v3325_v22   ;;  %v3362_v52 = vpop.permute.xlu0 %1109  ;;  %v328_v18 = vrot.slane %v327_v23, 2  ;;  %v799_v36 = vadd.f32 %v798_v6, %v797_v30 }
 0x1c7   :  { %1589 = vperm.xlu0 %2066, %v3367_v12   ;;  %2208 = vpow2.f32 %v1022_v3  ;;  %v917_v29 = vadd.f32 %v916_v7, %v915_v15  ;;  %v682_v38 = vrot.slane %v681_v16, 2  ;;  %v447_v11 = vadd.f32 %v446_v59, %v445_v27 }
 0x1c8   :  { %v2199_v53 = vpop.eup %2198  ;;  %v1024_v32 = vmul.f32 1.442695, %v1009_v46  ;;  %v329_v48 = vadd.f32 %v328_v18, %v327_v23  ;;  %v211_v7 = vadd.f32 %v210_v31, %v209_v8  ;;  %v3815_v18 = vmov 12  }
 0x1c9   :  { %v1026_v19 = vadd.f32 %v2199_v53, %v2197_v1  ;;  %v2201_v35 = vpop.eup %2200 }
 0x1ca   :  { %2210 = vpow2.f32 %v1024_v32  ;;  %1455 = vperm.xlu1 %2064, %v3342_v4   ;;  %v3371_v2 = vpop.permute.xlu1 %1045  ;;  %v3373_v49 = vpop.permute.xlu0 %1117  ;;  %v800_v32 = vrot.slane %v799_v36, 2 }
 0x1cb   :  { %3811 = vst [vmem:[#allocation11_spill] sm:$0xff] %v3373_v49  ;;  %v1027_v17 = vadd.f32 %v2201_v35, %v1026_v19  ;;  %2069 = vset.pattern.permute.xlu0 %v3687_v33  ;;  %v918_v19 = vrot.slane %v917_v29, 2  ;;  %v448_v49 = vrot.slane %v447_v11, 1 }
 0x1cc   :  { %v2203_v28 = vpop.eup %2202  ;;  %1635 = vperm.xlu0 %2069, %v3812_v50  }
 0x1cd   :  { %v1028_v10 = vadd.f32 %v2203_v28, %v1027_v17  ;;  %v2205_v3 = vpop.eup %2204  ;;  %v565_v17 = vadd.f32 %v564_v20, %v563_v43  ;;  %v3814_v28 = vld [vmem:[#allocation14_spill] sm:$0xff]  ;;  %v919_v59 = vadd.f32 %v918_v19, %v917_v29 }
 0x1ce   :  { %1463 = vperm.xlu1 %2064, %v3357_v25   ;;  %v3378_v44 = vpop.permute.xlu1 %1049 }
 0x1cf   :  { %v1029_v26 = vadd.f32 %v2205_v3, %v1028_v10  ;;  %v3380_v46 = vpop.permute.xlu0 %1163  ;;  %v683_v10 = vadd.f32 %v682_v38, %v681_v16  ;;  %v566_v8 = vrot.slane %v565_v17, 1 }
 0x1d0   :  { %v2207_v1 = vpop.eup %2206  ;;  %1647 = vperm.xlu0 %2069, %v3813_v60  }
 0x1d1   :  { %v1030_v39 = vadd.f32 %v2207_v1, %v1029_v26  ;;  %v2209_v53 = vpop.eup %2208  ;;  %v330_v26 = vrot.slane %v329_v48, 1  ;;  %v801_v1 = vadd.f32 %v800_v32, %v799_v36  ;;  %v684_v16 = vrot.slane %v683_v10, 1 }
 0x1d2   :  { %1471 = vperm.xlu1 %2064, %v3367_v12   ;;  %v3384_v30 = vpop.permute.xlu1 %1057  ;;  %v567_v29 = vadd.f32 %v566_v8, %v565_v17 }
 0x1d3   :  { %v1031_v15 = vadd.f32 %v2209_v53, %v1030_v39  ;;  %v1176_v35 = vpop.permute.xlu0 %1175  ;;  %v212_v39 = vrot.slane %v211_v7, 1  ;;  %v331_v31 = vadd.f32 %v330_v26, %v329_v48  ;;  %v802_v36 = vrot.slane %v801_v1, 1 }
 0x1d4   :  { %v2211_v6 = vpop.eup %2210  ;;  %1655 = vperm.xlu0 %2069, %v3814_v28   ;;  %v449_v53 = vadd.f32 %v448_v49, %v447_v11  ;;  %v1194_v48 = vsub.f32 %v2683_v61, %v1176_v35 }
 0x1d5   :  { %v1032_v3 = vsel %vm205_vm0, %v2211_v6, 0.0  ;;  %v213_v6 = vadd.f32 %v212_v39, %v211_v7 }
 0x1d6   :  { %v1033_v23 = vadd.f32 %v1032_v3, %v1031_v15  ;;  %2067 = vset.pattern.permute.xlu1 %v3815_v18  ;;  %v3389_v33 = vpop.permute.xlu1 %1065  ;;  %v920_v15 = vrot.slane %v919_v59, 1  ;;  %v685_v3 = vadd.f32 %v684_v16, %v683_v10 }
 0x1d7   :  { %1517 = vperm.xlu1 %2067, %v3812_v50   ;;  %v1184_v27 = vpop.permute.xlu0 %1183  ;;  %v1985_v11 = vsel %vm1984_vm1, %v213_v6, %v331_v31 }
 0x1d8   :  { %v1034_v43 = vrot.slane %v1033_v23, 4  ;;  %1679 = vperm.xlu0 %2069, %v3154_v24   ;;  %v1987_v7 = vsel %vm1986_vm2, %v1985_v11, %v449_v53  ;;  %v1196_v39 = vsub.f32 %v2699_v5, %v1184_v27 }
 0x1d9   :  { %v1989_v10 = vsel %vm1988_vm3, %v1987_v7, %v567_v29 }
 0x1da   :  { %v1035_v20 = vadd.f32 %v1034_v43, %v1033_v23  ;;  %v3393_v38 = vpop.permute.xlu1 %1089  ;;  %v803_v23 = vadd.f32 %v802_v36, %v801_v1  ;;  %v921_v43 = vadd.f32 %v920_v15, %v919_v59  ;;  %v1990_v35 = vsel %vm205_vm0, %v1989_v10, %v685_v3 }
 0x1db   :  { %1521 = vperm.xlu1 %2067, %v3113_v14   ;;  %v3396_v32 = vpop.permute.xlu0 %1207  ;;  %v1202_v1 = vmul.f32 %v1194_v48, %v1194_v48  ;;  %v1204_v6 = vmul.f32 %v1196_v39, %v1196_v39 }
 0x1dc   :  { %1687 = vperm.xlu0 %2069, %v3177_v62   ;;  %v1036_v19 = vrot.slane %v1035_v20, 2  ;;  %v1992_v59 = vsel %vm1991_vm4, %v1990_v35, %v803_v23  ;;  %v1191_v35 = vsub.f32 %v2659_v54, %v3380_v46 }
 0x1de   :  { %v3400_v26 = vpop.permute.xlu1 %1097  ;;  %v1037_v49 = vadd.f32 %v1036_v19, %v1035_v20  ;;  %v1994_v20 = vsel %vm1993_vm5, %v1992_v59, %v921_v43 }
 0x1df   :  { %1529 = vperm.xlu1 %2067, %v3813_v60   ;;  %v1216_v18 = vpop.permute.xlu0 %1215 }
 0x1e0   :  { %1695 = vperm.xlu0 %2069, %v3202_v47   ;;  %v1038_v17 = vrot.slane %v1037_v49, 1 }
 0x1e2   :  { %v3409_v8 = vpop.permute.xlu1 %1105  ;;  %v1039_v16 = vadd.f32 %v1038_v17, %v1037_v49  ;;  %v3816_v17 = vmov 13  }
 0x1e3   :  { %1537 = vperm.xlu1 %2067, %v3814_v28   ;;  %v1224_v31 = vpop.permute.xlu0 %1223  ;;  %v2405_v28 = vmov 14  }
 0x1e4   :  { %v3414_v36 = vmul.f32 %v1224_v31, %v1202_v1  ;;  %1703 = vperm.xlu0 %2069, %v3218_v57   ;;  %v1996_v53 = vsel %vm1995_vm6, %v1994_v20, %v1039_v16  ;;  %v1072_v20 = vsub.f32 %v2651_v51, %v3254_v63  ;;  %v1074_v63 = vsub.f32 %v2667_v56, %v3378_v44 }
 0x1e5   :  { %v2004_v15 = vmul.f32 0.016666668, %v1996_v53  ;;  %v1199_v53 = vmul.f32 %v1191_v35, %v1191_v35 }
 0x1e6   :  { %v3418_v29 = vpop.permute.xlu1 %1113 }
 0x1e7   :  { %1561 = vperm.xlu1 %2067, %v3154_v24   ;;  %v1232_v27 = vpop.permute.xlu0 %1231  ;;  %2006 = vst [vmem:[#allocation2] sm:$0xff] %v2004_v15 }
 0x1e8   :  { %v3421_v19 = vmul.f32 %v1232_v27, %v1204_v6  ;;  %2070 = vset.pattern.permute.xlu0 %v2405_v28 }
 0x1e9   :  { %1749 = vperm.xlu0 %2070, %v3244_v13  }
 0x1eb   :  { %1569 = vperm.xlu1 %2067, %v3177_v62   ;;  %v1160_v3 = vpop.permute.xlu1 %1159 }
 0x1ec   :  { %v3426_v48 = vpop.permute.xlu0 %1277  ;;  %v1190_v49 = vsub.f32 %v2651_v51, %v1160_v3 }
 0x1ed   :  { %1761 = vperm.xlu0 %2070, %v3260_v37  }
 0x1ee   :  { %v1198_v7 = vmul.f32 %v1190_v49, %v1190_v49  ;;  %v1080_v49 = vmul.f32 %v1072_v20, %v1072_v20  ;;  %v1082_v20 = vmul.f32 %v1074_v63, %v1074_v63 }
 0x1ef   :  { %1577 = vperm.xlu1 %2067, %v3202_v47   ;;  %v1168_v23 = vpop.permute.xlu1 %1167 }
 0x1f0   :  { %v1290_v24 = vpop.permute.xlu0 %1289  ;;  %v1192_v62 = vsub.f32 %v2667_v56, %v1168_v23  ;;  %v1238_v39 = vmul.f32 %v3396_v32, %v1198_v7  ;;  %v1073_v32 = vsub.f32 %v2659_v54, %v3371_v2 }
 0x1f1   :  { %1801 = vperm.xlu0 %2070, %v3325_v22   ;;  %v1311_v16 = vsub.f32 %v2673_v58, %v1290_v24 }
 0x1f2   :  { %v1200_v1 = vmul.f32 %v1192_v62, %v1192_v62  ;;  %v1246_v6 = vmul.f32 1.442695, %v1238_v39 }
 0x1f3   :  { %1585 = vperm.xlu1 %2067, %v3218_v57   ;;  %v1172_v11 = vpop.permute.xlu1 %1171  ;;  %v1319_v27 = vmul.f32 %v1311_v16, %v1311_v16 }
 0x1f4   :  { %v1298_v43 = vpop.permute.xlu0 %1297  ;;  %v1240_v15 = vmul.f32 %v1216_v18, %v1200_v1  ;;  %v1193_v46 = vsub.f32 %v2673_v58, %v1172_v11  ;;  %v2406_v18 = vmov 15   ;;  %2212 = vpow2.f32 %v1246_v6 }
 0x1f5   :  { %1769 = vperm.xlu0 %2070, %v3279_v55   ;;  %v1313_v3 = vsub.f32 %v2689_v0, %v1298_v43  ;;  %v1081_v43 = vmul.f32 %v1073_v32, %v1073_v32 }
 0x1f6   :  { %v1250_v11 = vmul.f32 1.442695, %v1240_v15  ;;  %v1201_v2 = vmul.f32 %v1193_v46, %v1193_v46 }
 0x1f7   :  { %2068 = vset.pattern.permute.xlu1 %v3816_v17  ;;  %v1180_v10 = vpop.permute.xlu1 %1179  ;;  %v1321_v35 = vmul.f32 %v1313_v3, %v1313_v3 }
 0x1f8   :  { %1631 = vperm.xlu1 %2068, %v3244_v13   ;;  %v1306_v47 = vpop.permute.xlu0 %1305  ;;  %v1195_v7 = vsub.f32 %v2689_v0, %v1180_v10  ;;  %v1254_v10 = vmul.f32 1.442695, %v3414_v36 }
 0x1f9   :  { %1777 = vperm.xlu0 %2070, %v3304_v42   ;;  %v1315_v1 = vsub.f32 %v2705_v9, %v1306_v47  ;;  %v1121_v47 = vmul.f32 %v3334_v41, %v1081_v43  ;;  %v1258_v41 = vmul.f32 1.442695, %v3421_v19 }
 0x1fb   :  { %v3442_v59 = vpop.permute.xlu1 %1187  ;;  %v1323_v32 = vmul.f32 %v1315_v1, %v1315_v1 }
 0x1fc   :  { %1639 = vperm.xlu1 %2068, %v3113_v14   ;;  %v3445_v31 = vpop.permute.xlu0 %1329 }
 0x1fd   :  { %1817 = vperm.xlu0 %2070, %v3357_v25  }
 0x1ff   :  { %v1212_v23 = vpop.permute.xlu1 %1211 }
 0x200   :  { %v1239_v14 = vmul.f32 %v1212_v23, %v1199_v53  ;;  %1643 = vperm.xlu1 %2068, %v3260_v37   ;;  %v1338_v24 = vpop.permute.xlu0 %1337  ;;  %v1120_v53 = vmul.f32 %v3393_v38, %v1080_v49 }
 0x201   :  { %v3457_v62 = vmul.f32 %v1338_v24, %v1319_v27  ;;  %2081 = vset.pattern.permute.xlu0 %v2406_v18  ;;  %v1122_v27 = vmul.f32 %v3400_v26, %v1082_v20 }
 0x202   :  { %v1248_v17 = vmul.f32 1.442695, %v1239_v14  ;;  %1871 = vperm.xlu0 %2081, %v3812_v50   ;;  %v1203_v50 = vmul.f32 %v1195_v7, %v1195_v7  ;;  %v1128_v36 = vmul.f32 1.442695, %v1120_v53  ;;  %v1076_v14 = vsub.f32 %v2683_v61, %v3384_v30 }
 0x203   :  { %v1220_v39 = vpop.permute.xlu1 %1219  ;;  %v1132_v63 = vmul.f32 1.442695, %v1122_v27 }
 0x204   :  { %2214 = vpow2.f32 %v1248_v17  ;;  %v1241_v44 = vmul.f32 %v1220_v39, %v1201_v2  ;;  %1651 = vperm.xlu1 %2068, %v3279_v55   ;;  %v1346_v16 = vpop.permute.xlu0 %1345  ;;  %v1075_v55 = vsub.f32 %v2673_v58, %v3272_v21  ;;  %v1130_v21 = vmul.f32 1.442695, %v1121_v47 }
 0x205   :  { %v3465_v15 = vmul.f32 %v1346_v16, %v1321_v35  ;;  %2216 = vpow2.f32 %v1250_v11  ;;  %v1084_v7 = vmul.f32 %v1076_v14, %v1076_v14  ;;  %v1077_v17 = vsub.f32 %v2689_v0, %v3296_v34 }
 0x206   :  { %v1252_v46 = vmul.f32 1.442695, %v1241_v44  ;;  %1919 = vperm.xlu0 %2081, %v3325_v22   ;;  %v1083_v26 = vmul.f32 %v1075_v55, %v1075_v55  ;;  %v1197_v35 = vsub.f32 %v2705_v9, %v3442_v59  ;;  %v1078_v16 = vsub.f32 %v2699_v5, %v3389_v33 }
 0x207   :  { %v1228_v6 = vpop.permute.xlu1 %1227  ;;  %v1085_v53 = vmul.f32 %v1077_v17, %v1077_v17  ;;  %v1079_v59 = vsub.f32 %v2705_v9, %v3316_v45 }
 0x208   :  { %2218 = vpow2.f32 %v1252_v46  ;;  %v1243_v38 = vmul.f32 %v1228_v6, %v1203_v50  ;;  %1659 = vperm.xlu1 %2068, %v3304_v42   ;;  %v1354_v3 = vpop.permute.xlu0 %1353  ;;  %v2213_v42 = vpop.eup %2212  ;;  %v1123_v30 = vmul.f32 %v3350_v40, %v1083_v26  ;;  %v1205_v46 = vmul.f32 %v1197_v35, %v1197_v35 }
 0x209   :  { %v3474_v23 = vmul.f32 %v1354_v3, %v1323_v32  ;;  %2220 = vpow2.f32 %v1254_v10  ;;  %v1125_v33 = vmul.f32 %v3362_v52, %v1085_v53  ;;  %v1086_v55 = vmul.f32 %v1078_v16, %v1078_v16  ;;  %v2357_v53 = vld [vmem:[%s3675_s1 + $0x10] sm:$0xff] }
 0x20a   :  { %v1256_v24 = vmul.f32 1.442695, %v1243_v38  ;;  %1883 = vperm.xlu0 %2081, %v3813_v60   ;;  %v1134_v44 = vmul.f32 1.442695, %v1123_v30 }
 0x20b   :  { %v1236_v49 = vpop.permute.xlu1 %1235 }
 0x20c   :  { %2222 = vpow2.f32 %v1256_v24  ;;  %1683 = vperm.xlu1 %2068, %v3325_v22   ;;  %v1124_v22 = vmul.f32 %v3409_v8, %v1084_v7  ;;  %v1245_v3 = vmul.f32 %v1236_v49, %v1205_v46  ;;  %v1087_v24 = vmul.f32 %v1079_v59, %v1079_v59 }
 0x20d   :  { %2224 = vpow2.f32 %v1128_v36  ;;  %v3481_v11 = vpop.permute.xlu0 %1399  ;;  %v1308_v49 = vsub.f32 %v2651_v51, %v3426_v48 }
 0x20e   :  { %v2215_v2 = vpop.eup %2214  ;;  %2226 = vpow2.f32 %v1258_v41  ;;  %1927 = vperm.xlu0 %2081, %v3342_v4   ;;  %v1136_v10 = vmul.f32 1.442695, %v1124_v22  ;;  %v1260_v30 = vmul.f32 1.442695, %v1245_v3  ;;  %v2356_v22 = vld [vmem:[%s3675_s1 + $0x8] sm:$0xff] }
 0x20f   :  { %2228 = vpow2.f32 %v1130_v21  ;;  %v1262_v60 = vadd.f32 %v2215_v2, %v2213_v42  ;;  %v2217_v19 = vpop.eup %2216  ;;  %v1316_v48 = vmul.f32 %v1308_v49, %v1308_v49  ;;  %v1370_v3 = vmul.f32 1.442695, %v3457_v62 }
 0x210   :  { %2230 = vpow2.f32 %v1132_v63  ;;  %1691 = vperm.xlu1 %2068, %v3342_v4   ;;  %v1282_v43 = vpop.permute.xlu1 %1281  ;;  %v1138_v63 = vmul.f32 1.442695, %v1125_v33  ;;  %v1378_v62 = vmul.f32 1.442695, %v3474_v23  ;;  %v2358_v23 = vld [vmem:[%s3676_s2] sm:$0xff] }
 0x211   :  { %v1263_v40 = vadd.f32 %v2217_v19, %v1262_v60  ;;  %v1412_v1 = vpop.permute.xlu0 %1411  ;;  %v1309_v8 = vsub.f32 %v2659_v54, %v1282_v43  ;;  %2232 = vpow2.f32 %v1134_v44 }
 0x212   :  { %v2219_v39 = vpop.eup %2218  ;;  %1935 = vperm.xlu0 %2081, %v3357_v25   ;;  %2234 = vpow2.f32 %v1136_v10  ;;  %v1430_v60 = vsub.f32 %v2683_v61, %v1412_v1 }
 0x213   :  { %v1264_v20 = vadd.f32 %v2219_v39, %v1263_v40  ;;  %v2221_v34 = vpop.eup %2220  ;;  %v1317_v14 = vmul.f32 %v1309_v8, %v1309_v8  ;;  %2236 = vpow2.f32 %v1138_v63 }
 0x214   :  { %1699 = vperm.xlu1 %2068, %v3357_v25   ;;  %v1286_v50 = vpop.permute.xlu1 %1285  ;;  %v1126_v25 = vmul.f32 %v3418_v29, %v1086_v55  ;;  %2238 = vpow2.f32 %v1260_v30  ;;  %v1438_v39 = vmul.f32 %v1430_v60, %v1430_v60 }
 0x215   :  { %v1265_v47 = vadd.f32 %v2221_v34, %v1264_v20  ;;  %v1420_v32 = vpop.permute.xlu0 %1419  ;;  %v1357_v7 = vmul.f32 %v3445_v31, %v1317_v14  ;;  %v1310_v40 = vsub.f32 %v2667_v56, %v1286_v50 }
 0x216   :  { %v2223_v6 = vpop.eup %2222  ;;  %1939 = vperm.xlu0 %2081, %v3218_v57   ;;  %v3817_v57 = vld [vmem:[#allocation11_spill] sm:$0xff]  ;;  %v1140_v29 = vmul.f32 1.442695, %v1126_v25  ;;  %v1432_v44 = vsub.f32 %v2699_v5, %v1420_v32 }
 0x217   :  { %v2225_v27 = vpop.eup %2224  ;;  %v1266_v38 = vadd.f32 %v2223_v6, %v1265_v47  ;;  %v1127_v42 = vmul.f32 %v3817_v57, %v1087_v24  ;;  %v1366_v1 = vmul.f32 1.442695, %v1357_v7  ;;  %v1318_v50 = vmul.f32 %v1310_v40, %v1310_v40 }
 0x218   :  { %v2227_v36 = vpop.eup %2226  ;;  %1707 = vperm.xlu1 %2068, %v3367_v12   ;;  %v1294_v45 = vpop.permute.xlu1 %1293  ;;  %2240 = vpow2.f32 %v1140_v29  ;;  %v1440_v6 = vmul.f32 %v1432_v44, %v1432_v44 }
 0x219   :  { %v2229_v41 = vpop.eup %2228  ;;  %v3502_v21 = vadd.f32 %v2227_v36, %v1266_v38  ;;  %v3504_v26 = vpop.permute.xlu0 %1443  ;;  %v1142_v35 = vmul.f32 1.442695, %v1127_v42  ;;  %v1312_v46 = vsub.f32 %v2683_v61, %v1294_v45 }
 0x21a   :  { %v2231_v52 = vpop.eup %2230  ;;  %v1144_v2 = vadd.f32 %v2229_v41, %v2225_v27 }
 0x21b   :  { %v2233_v31 = vpop.eup %2232  ;;  %2242 = vpow2.f32 %v1142_v35  ;;  %v1320_v36 = vmul.f32 %v1312_v46, %v1312_v46 }
 0x21c   :  { %2071 = vset.pattern.permute.xlu1 %v2405_v28  ;;  %v1302_v19 = vpop.permute.xlu1 %1301  ;;  %v1145_v17 = vadd.f32 %v2231_v52, %v1144_v2  ;;  %v2235_v8 = vpop.eup %2234  ;;  %2244 = vpow2.f32 %v1366_v1  ;;  %v1374_v2 = vmul.f32 1.442695, %v3465_v15 }
 0x21d   :  { %1753 = vperm.xlu1 %2071, %v2356_v22   ;;  %v3515_v43 = vpop.permute.xlu0 %1451  ;;  %v1314_v25 = vsub.f32 %v2699_v5, %v1302_v19  ;;  %v2237_v45 = vpop.eup %2236 }
 0x21e   :  { %v1146_v20 = vadd.f32 %v2233_v31, %v1145_v17  ;;  %v2239_v24 = vpop.eup %2238 }
 0x21f   :  { %v1268_v30 = vsel %vm205_vm0, %v2239_v24, 0.0 }
 0x220   :  { %v1326_v16 = vpop.permute.xlu1 %1325  ;;  %v1147_v33 = vadd.f32 %v2235_v8, %v1146_v20 }
 0x221   :  { %v1356_v34 = vmul.f32 %v1326_v16, %v1316_v48  ;;  %1757 = vperm.xlu1 %2071, %v2357_v53   ;;  %v1460_v10 = vpop.permute.xlu0 %1459  ;;  %v1269_v48 = vadd.f32 %v1268_v30, %v3502_v21  ;;  %v2359_v30 = vld [vmem:[%s3675_s1 + $0x20] sm:$0xff] }
 0x222   :  { %v3522_v59 = vmul.f32 %v1460_v10, %v1438_v39  ;;  %v1148_v52 = vadd.f32 %v2237_v45, %v1147_v33  ;;  %v2241_v57 = vpop.eup %2240 }
 0x223   :  { %v1364_v47 = vmul.f32 1.442695, %v1356_v34  ;;  %v1270_v34 = vrot.slane %v1269_v48, 4 }
 0x224   :  { %v1334_v32 = vpop.permute.xlu1 %1333  ;;  %v1149_v60 = vadd.f32 %v2241_v57, %v1148_v52 }
 0x225   :  { %2246 = vpow2.f32 %v1364_v47  ;;  %v1358_v55 = vmul.f32 %v1334_v32, %v1318_v50  ;;  %2072 = vset.pattern.permute.xlu1 %v2406_v18  ;;  %v1468_v27 = vpop.permute.xlu0 %1467  ;;  %v2243_v7 = vpop.eup %2242 }
 0x226   :  { %v3526_v38 = vmul.f32 %v1468_v27, %v1440_v6  ;;  %1867 = vperm.xlu1 %2072, %v3244_v13   ;;  %v1322_v13 = vmul.f32 %v1314_v25, %v1314_v25  ;;  %v2245_v17 = vpop.eup %2244  ;;  %v1150_v40 = vsel %vm205_vm0, %v2243_v7, 0.0 }
 0x227   :  { %v1368_v14 = vmul.f32 1.442695, %v1358_v55  ;;  %v1151_v1 = vadd.f32 %v1150_v40, %v1149_v60  ;;  %v1271_v55 = vadd.f32 %v1270_v34, %v1269_v48 }
 0x228   :  { %v1342_v41 = vpop.permute.xlu1 %1341 }
 0x229   :  { %2248 = vpow2.f32 %v1368_v14  ;;  %v1360_v63 = vmul.f32 %v1342_v41, %v1320_v36  ;;  %v1152_v8 = vrot.slane %v1151_v1, 4 }
 0x22a   :  { %1875 = vperm.xlu1 %2072, %v2357_v53   ;;  %v3531_v42 = vpop.permute.xlu0 %1513  ;;  %2250 = vpow2.f32 %v1370_v3 }
 0x22b   :  { %v1372_v49 = vmul.f32 1.442695, %v1360_v63  ;;  %v1153_v25 = vadd.f32 %v1152_v8, %v1151_v1  ;;  %v1272_v63 = vrot.slane %v1271_v55, 2 }
 0x22c   :  { %v1350_v29 = vpop.permute.xlu1 %1349 }
 0x22d   :  { %2252 = vpow2.f32 %v1372_v49  ;;  %v1362_v19 = vmul.f32 %v1350_v29, %v1322_v13  ;;  %v1273_v60 = vadd.f32 %v1272_v63, %v1271_v55 }
 0x22e   :  { %2073 = vset.pattern.permute.xlu1 %v2405_v28  ;;  %v1526_v22 = vpop.permute.xlu0 %1525  ;;  %2254 = vpow2.f32 %v1374_v2  ;;  %v1154_v2 = vrot.slane %v1153_v25, 2 }
 0x22f   :  { %v2247_v35 = vpop.eup %2246  ;;  %v1376_v15 = vmul.f32 1.442695, %v1362_v19  ;;  %1797 = vperm.xlu1 %2073, %v2358_v23   ;;  %2256 = vpow2.f32 %v1378_v62  ;;  %v1547_v14 = vsub.f32 %v2673_v58, %v1526_v22 }
 0x230   :  { %v1380_v31 = vadd.f32 %v2247_v35, %v2245_v17  ;;  %v1427_v17 = vsub.f32 %v2659_v54, %v3481_v11  ;;  %v1155_v35 = vadd.f32 %v1154_v2, %v1153_v25 }
 0x231   :  { %2258 = vpow2.f32 %v1376_v15  ;;  %v1396_v39 = vpop.permute.xlu1 %1395  ;;  %v1555_v49 = vmul.f32 %v1547_v14, %v1547_v14 }
 0x232   :  { %v1426_v44 = vsub.f32 %v2651_v51, %v1396_v39  ;;  %v1534_v16 = vpop.permute.xlu0 %1533  ;;  %v1274_v39 = vrot.slane %v1273_v60, 1  ;;  %v1156_v34 = vrot.slane %v1155_v35, 1 }
 0x233   :  { %v2249_v20 = vpop.eup %2248  ;;  %2074 = vset.pattern.permute.xlu1 %v2406_v18  ;;  %v1549_v62 = vsub.f32 %v2689_v0, %v1534_v16  ;;  %v1435_v16 = vmul.f32 %v1427_v17, %v1427_v17 }
 0x234   :  { %v1381_v21 = vadd.f32 %v2249_v20, %v1380_v31  ;;  %v1434_v53 = vmul.f32 %v1426_v44, %v1426_v44  ;;  %1879 = vperm.xlu1 %2074, %v3260_v37   ;;  %v2251_v10 = vpop.eup %2250  ;;  %v1157_v25 = vadd.f32 %v1156_v34, %v1155_v35 }
 0x235   :  { %v1404_v50 = vpop.permute.xlu1 %1403  ;;  %v1557_v48 = vmul.f32 %v1549_v62, %v1549_v62 }
 0x236   :  { %v1382_v46 = vadd.f32 %v2251_v10, %v1381_v21  ;;  %v1474_v47 = vmul.f32 %v3504_v26, %v1434_v53  ;;  %v1428_v6 = vsub.f32 %v2667_v56, %v1404_v50  ;;  %v1542_v32 = vpop.permute.xlu0 %1541 }
 0x237   :  { %v2253_v33 = vpop.eup %2252  ;;  %v1551_v15 = vsub.f32 %v2705_v9, %v1542_v32 }
 0x238   :  { %v1383_v27 = vadd.f32 %v2253_v33, %v1382_v46  ;;  %v1436_v3 = vmul.f32 %v1428_v6, %v1428_v6  ;;  %1915 = vperm.xlu1 %2074, %v2358_v23   ;;  %v2255_v36 = vpop.eup %2254  ;;  %v2360_v23 = vld [vmem:[%s3676_s2 + $0x10] sm:$0xff]  ;;  %v1482_v21 = vmul.f32 1.442695, %v1474_v47  ;;  %v1275_v6 = vadd.f32 %v1274_v39, %v1273_v60 }
 0x239   :  { %v1408_v45 = vpop.permute.xlu1 %1407  ;;  %v2257_v37 = vpop.eup %2256  ;;  %v1559_v53 = vmul.f32 %v1551_v15, %v1551_v15 }
 0x23a   :  { %v1384_v41 = vadd.f32 %v2255_v36, %v1383_v27  ;;  %v1476_v24 = vmul.f32 %v3515_v43, %v1436_v3  ;;  %v3549_v52 = vpop.permute.xlu0 %1565  ;;  %v1386_v13 = vsel %vm205_vm0, %v2257_v37, 0.0  ;;  %v1429_v11 = vsub.f32 %v2673_v58, %v1408_v45 }
 0x23b   :  { %v2259_v26 = vpop.eup %2258  ;;  %2260 = vpow2.f32 %v1482_v21  ;;  %v1490_v37 = vmul.f32 1.442695, %v3522_v59  ;;  %v1494_v59 = vmul.f32 1.442695, %v3526_v38  ;;  %v2362_v38 = vld [vmem:[%s3675_s1 + $0x30] sm:$0xff] }
 0x23c   :  { %v1385_v57 = vadd.f32 %v2259_v26, %v1384_v41  ;;  %2075 = vset.pattern.permute.xlu1 %v2405_v28  ;;  %v1486_v32 = vmul.f32 1.442695, %v1476_v24  ;;  %v1437_v27 = vmul.f32 %v1429_v11, %v1429_v11  ;;  %v1997_v41 = vsel %vm1984_vm1, %v1157_v25, %v1275_v6 }
 0x23d   :  { %1765 = vperm.xlu1 %2075, %v2359_v30   ;;  %v1416_v29 = vpop.permute.xlu1 %1415 }
 0x23e   :  { %v1387_v43 = vadd.f32 %v1386_v13, %v1385_v57  ;;  %v1574_v7 = vpop.permute.xlu0 %1573  ;;  %v1431_v3 = vsub.f32 %v2689_v0, %v1416_v29 }
 0x23f   :  { %v3557_v19 = vmul.f32 %v1574_v7, %v1555_v49 }
 0x240   :  { %v1388_v22 = vrot.slane %v1387_v43, 4  ;;  %v1439_v24 = vmul.f32 %v1431_v3, %v1431_v3 }
 0x241   :  { %1805 = vperm.xlu1 %2075, %v2360_v23   ;;  %v1424_v40 = vpop.permute.xlu1 %1423 }
 0x242   :  { %v1389_v31 = vadd.f32 %v1388_v22, %v1387_v43  ;;  %v1582_v1 = vpop.permute.xlu0 %1581  ;;  %v1433_v26 = vsub.f32 %v2705_v9, %v1424_v40 }
 0x243   :  { %v3565_v44 = vmul.f32 %v1582_v1, %v1557_v48  ;;  %v2363_v1 = vld [vmem:[%s3676_s2 + $0x20] sm:$0xff] }
 0x244   :  { %v1390_v20 = vrot.slane %v1389_v31, 2  ;;  %v1441_v49 = vmul.f32 %v1433_v26, %v1433_v26 }
 0x245   :  { %2076 = vset.pattern.permute.xlu1 %v2406_v18  ;;  %v1448_v10 = vpop.permute.xlu1 %1447  ;;  %v2261_v43 = vpop.eup %2260 }
 0x246   :  { %v1391_v8 = vadd.f32 %v1390_v20, %v1389_v31  ;;  %v1475_v50 = vmul.f32 %v1448_v10, %v1435_v16  ;;  %1923 = vperm.xlu1 %2076, %v2360_v23   ;;  %v1590_v46 = vpop.permute.xlu0 %1589 }
 0x247   :  { %v3569_v33 = vmul.f32 %v1590_v46, %v1559_v53  ;;  %v1544_v46 = vsub.f32 %v2651_v51, %v3531_v42 }
 0x248   :  { %v1392_v55 = vrot.slane %v1391_v8, 1  ;;  %v1484_v36 = vmul.f32 1.442695, %v1475_v50 }
 0x249   :  { %v1456_v47 = vpop.permute.xlu1 %1455  ;;  %v1552_v3 = vmul.f32 %v1544_v46, %v1544_v46 }
 0x24a   :  { %v1393_v14 = vadd.f32 %v1392_v55, %v1391_v8  ;;  %2262 = vpow2.f32 %v1484_v36  ;;  %v1477_v45 = vmul.f32 %v1456_v47, %v1437_v27  ;;  %2077 = vset.pattern.permute.xlu1 %v2405_v28  ;;  %v2364_v47 = vld [vmem:[%s3675_s1 + $0x38] sm:$0xf] }
 0x24b   :  { %2264 = vpow2.f32 %v1486_v32  ;;  %1809 = vperm.xlu1 %2077, %v3342_v4   ;;  %v2361_v4 = vld [vmem:[%s3675_s1 + $0x28] sm:$0xff]  ;;  %v3603_v26 = vpop.permute.xlu0 %1635 }
 0x24c   :  { %v1488_v63 = vmul.f32 1.442695, %v1477_v45  ;;  %v3578_v57 = vsel %vm1986_vm2, %v1997_v41, %v1393_v14 }
 0x24d   :  { %v1464_v2 = vpop.permute.xlu1 %1463 }
 0x24e   :  { %2266 = vpow2.f32 %v1488_v63  ;;  %v1479_v13 = vmul.f32 %v1464_v2, %v1439_v24 }
 0x24f   :  { %2078 = vset.pattern.permute.xlu1 %v2406_v18  ;;  %2268 = vpow2.f32 %v1490_v37 }
 0x250   :  { %v1492_v62 = vmul.f32 1.442695, %v1479_v13  ;;  %1887 = vperm.xlu1 %2078, %v2361_v4  }
 0x251   :  { %v1472_v30 = vpop.permute.xlu1 %1471 }
 0x252   :  { %2270 = vpow2.f32 %v1492_v62  ;;  %v1481_v29 = vmul.f32 %v1472_v30, %v1441_v49  ;;  %v1606_v62 = vmul.f32 1.442695, %v3557_v19 }
 0x253   :  { %2272 = vpow2.f32 %v1494_v59  ;;  %v2365_v59 = vld [vmem:[%s3676_s2 + $0x30] sm:$0xff] }
 0x254   :  { %v2263_v7 = vpop.eup %2262  ;;  %v1496_v60 = vmul.f32 1.442695, %v1481_v29  ;;  %2079 = vset.pattern.permute.xlu1 %v2405_v28 }
 0x255   :  { %v2265_v17 = vpop.eup %2264  ;;  %v1498_v22 = vadd.f32 %v2263_v7, %v2261_v43  ;;  %1773 = vperm.xlu1 %2079, %v2362_v38  }
 0x256   :  { %2274 = vpow2.f32 %v1496_v60  ;;  %v1518_v35 = vpop.permute.xlu1 %1517 }
 0x257   :  { %v1499_v48 = vadd.f32 %v2265_v17, %v1498_v22  ;;  %v1545_v15 = vsub.f32 %v2659_v54, %v1518_v35  ;;  %v1610_v22 = vmul.f32 1.442695, %v3565_v44  ;;  %v1614_v35 = vmul.f32 1.442695, %v3569_v33 }
 0x258   :  { %v2267_v23 = vpop.eup %2266 }
 0x259   :  { %v1500_v40 = vadd.f32 %v2267_v23, %v1499_v48  ;;  %v1553_v31 = vmul.f32 %v1545_v15, %v1545_v15  ;;  %1813 = vperm.xlu1 %2079, %v2363_v1   ;;  %v2269_v39 = vpop.eup %2268 }
 0x25a   :  { %v1522_v16 = vpop.permute.xlu1 %1521 }
 0x25b   :  { %v1501_v20 = vadd.f32 %v2269_v39, %v1500_v40  ;;  %v1593_v11 = vmul.f32 %v3549_v52, %v1553_v31  ;;  %v1546_v52 = vsub.f32 %v2667_v56, %v1522_v16 }
 0x25c   :  { %v2271_v34 = vpop.eup %2270 }
 0x25d   :  { %v1502_v21 = vadd.f32 %v2271_v34, %v1501_v20  ;;  %2080 = vset.pattern.permute.xlu1 %v2406_v18  ;;  %v2273_v53 = vpop.eup %2272  ;;  %v1602_v25 = vmul.f32 1.442695, %v1593_v11  ;;  %v1554_v42 = vmul.f32 %v1546_v52, %v1546_v52 }
 0x25e   :  { %1891 = vperm.xlu1 %2080, %v2362_v38   ;;  %v1530_v10 = vpop.permute.xlu1 %1529 }
 0x25f   :  { %v1503_v8 = vadd.f32 %v2273_v53, %v1502_v21  ;;  %v1548_v41 = vsub.f32 %v2683_v61, %v1530_v10  ;;  %2276 = vpow2.f32 %v1602_v25 }
 0x260   :  { %v2275_v50 = vpop.eup %2274 }
 0x261   :  { %v1504_v6 = vsel %vm205_vm0, %v2275_v50, 0.0  ;;  %v1556_v4 = vmul.f32 %v1548_v41, %v1548_v41 }
 0x262   :  { %v1505_v32 = vadd.f32 %v1504_v6, %v1503_v8  ;;  %1931 = vperm.xlu1 %2080, %v2363_v1   ;;  %v1538_v55 = vpop.permute.xlu1 %1537 }
 0x263   :  { %v1550_v30 = vsub.f32 %v2699_v5, %v1538_v55 }
 0x264   :  { %v1506_v27 = vrot.slane %v1505_v32, 4 }
 0x265   :  { %v1558_v38 = vmul.f32 %v1550_v30, %v1550_v30 }
 0x266   :  { %v1507_v36 = vadd.f32 %v1506_v27, %v1505_v32  ;;  %1895 = vperm.xlu1 %2080, %v2364_v47   ;;  %v1562_v14 = vpop.permute.xlu1 %1561 }
 0x267   :  { %v1592_v45 = vmul.f32 %v1562_v14, %v1552_v3  ;;  %v1663_v14 = vsub.f32 %v2659_v54, %v3603_v26 }
 0x268   :  { %v1508_v37 = vrot.slane %v1507_v36, 2 }
 0x269   :  { %v1600_v24 = vmul.f32 1.442695, %v1592_v45  ;;  %v2277_v23 = vpop.eup %2276 }
 0x26a   :  { %v1509_v63 = vadd.f32 %v1508_v37, %v1507_v36  ;;  %2082 = vset.pattern.permute.xlu1 %v2405_v28  ;;  %v1570_v2 = vpop.permute.xlu1 %1569  ;;  %v1648_v28 = vpop.permute.xlu0 %1647 }
 0x26b   :  { %2278 = vpow2.f32 %v1600_v24  ;;  %v1594_v13 = vmul.f32 %v1570_v2, %v1554_v42  ;;  %1821 = vperm.xlu1 %2082, %v2365_v59   ;;  %v1666_v37 = vsub.f32 %v2683_v61, %v1648_v28 }
 0x26c   :  { %v1510_v49 = vrot.slane %v1509_v63, 1 }
 0x26d   :  { %v1604_v29 = vmul.f32 1.442695, %v1594_v13  ;;  %v1671_v13 = vmul.f32 %v1663_v14, %v1663_v14 }
 0x26e   :  { %v1511_v43 = vadd.f32 %v1510_v49, %v1509_v63  ;;  %v1578_v7 = vpop.permute.xlu1 %1577  ;;  %v1656_v44 = vpop.permute.xlu0 %1655 }
 0x26f   :  { %2280 = vpow2.f32 %v1604_v29  ;;  %v1596_v60 = vmul.f32 %v1578_v7, %v1556_v4  ;;  %1825 = vperm.xlu1 %2082, %v3367_v12   ;;  %v2366_v12 = vld [vmem:[%s3676_s2 + $0x38] sm:$0xf]  ;;  %v1668_v4 = vsub.f32 %v2699_v5, %v1656_v44  ;;  %s2407_s2 = smov [#allocation2]  }
 0x270   :  { %v3614_v17 = vsel %vm1988_vm3, %v3578_v57, %v1511_v43  ;;  %2282 = vpow2.f32 %v1606_v62  ;;  %v1674_v62 = vmul.f32 %v1666_v37, %v1666_v37  ;;  %s2013_s19 = sshll.u32 %s2407_s2, 4  ;;  %s2014_s19 = int_to_ptr.vmem [resolvable:$true] %s2013_s19 }
 0x271   :  { %v1608_v19 = vmul.f32 1.442695, %v1596_v60  ;;  %s2367_s20 = scalar_lea.vmem %s2014_s19, 256  ;;  %p2372_p1 = scmp.lt.s32.totalorder %s2014_s19, %s2014_s19 }
 0x272   :  { %v1586_v48 = vpop.permute.xlu1 %1585  ;;  %v1680_v11 = vpop.permute.xlu0 %1679  ;;  %p2368_p0 = scmp.ne.s32.totalorder %s2014_s19, %s2367_s20  ;;  %p2373_p2 = scmp.lt.s32.totalorder %s2367_s20, %s2367_s20 }
 0x273   :  { %2284 = vpow2.f32 %v1608_v19  ;;  %v1598_v15 = vmul.f32 %v1586_v48, %v1558_v38  ;;  %2083 = vset.pattern.permute.xlu1 %v2406_v18  ;;  %v1676_v48 = vmul.f32 %v1668_v4, %v1668_v4 }
 0x274   :  { %1943 = vperm.xlu1 %2083, %v2366_v12   ;;  %2286 = vpow2.f32 %v1610_v22  ;;  %p2374_p3 = por %p2373_p2, %p2372_p1 }
 0x275   :  { %v2279_v57 = vpop.eup %2278  ;;  %v1612_v40 = vmul.f32 1.442695, %v1598_v15  ;;  %2288 = vpow2.f32 %v1614_v35 }
 0x276   :  { %v1616_v31 = vadd.f32 %v2279_v57, %v2277_v23  ;;  %v1688_v55 = vpop.permute.xlu0 %1687  ;;  %p2375_p4 = pnand %p2374_p3, %p2368_p0 }
 0x277   :  { %2290 = vpow2.f32 %v1612_v40  ;;  %v1632_v1 = vpop.permute.xlu1 %1631 }
 0x278   :  { %v1662_v10 = vsub.f32 %v2651_v51, %v1632_v1 }
 0x279   :  { %v2281_v33 = vpop.eup %2280 }
 0x27a   :  { %v1617_v39 = vadd.f32 %v2281_v33, %v1616_v31  ;;  %v2283_v16 = vpop.eup %2282  ;;  %v1670_v52 = vmul.f32 %v1662_v10, %v1662_v10  ;;  %v1696_v24 = vpop.permute.xlu0 %1695 }
 0x27b   :  { %v1640_v20 = vpop.permute.xlu1 %1639  ;;  %v1714_v26 = vmul.f32 %v1696_v24, %v1674_v62 }
 0x27c   :  { %v1618_v18 = vadd.f32 %v2283_v16, %v1617_v39  ;;  %v1664_v32 = vsub.f32 %v2667_v56, %v1640_v20  ;;  %v1710_v42 = vmul.f32 %v1680_v11, %v1670_v52 }
 0x27d   :  { %v2285_v34 = vpop.eup %2284  ;;  %v1726_v57 = vmul.f32 1.442695, %v1714_v26 }
 0x27e   :  { %v1619_v21 = vadd.f32 %v2285_v34, %v1618_v18  ;;  %v2287_v53 = vpop.eup %2286  ;;  %v1672_v47 = vmul.f32 %v1664_v32, %v1664_v32  ;;  %v1718_v30 = vmul.f32 1.442695, %v1710_v42  ;;  %v1704_v22 = vpop.permute.xlu0 %1703 }
 0x27f   :  { %v1644_v8 = vpop.permute.xlu1 %1643  ;;  %v2289_v50 = vpop.eup %2288  ;;  %v1716_v40 = vmul.f32 %v1704_v22, %v1676_v48 }
 0x280   :  { %v1620_v46 = vadd.f32 %v2287_v53, %v1619_v21  ;;  %v1622_v3 = vsel %vm205_vm0, %v2289_v50, 0.0  ;;  %v1712_v2 = vmul.f32 %v1688_v55, %v1672_v47  ;;  %v1665_v49 = vsub.f32 %v2673_v58, %v1644_v8 }
 0x281   :  { %v2291_v6 = vpop.eup %2290  ;;  %2292 = vpow2.f32 %v1718_v30  ;;  %v1730_v20 = vmul.f32 1.442695, %v1716_v40 }
 0x282   :  { %v1621_v27 = vadd.f32 %v2291_v6, %v1620_v46  ;;  %v1722_v60 = vmul.f32 1.442695, %v1712_v2  ;;  %v1673_v38 = vmul.f32 %v1665_v49, %v1665_v49  ;;  %v1750_v2 = vpop.permute.xlu0 %1749 }
 0x283   :  { %v1652_v36 = vpop.permute.xlu1 %1651 }
 0x284   :  { %v1623_v25 = vadd.f32 %v1622_v3, %v1621_v27  ;;  %v1667_v19 = vsub.f32 %v2689_v0, %v1652_v36 }
 0x286   :  { %v1624_v45 = vrot.slane %v1623_v25, 4  ;;  %v1675_v44 = vmul.f32 %v1667_v19, %v1667_v19  ;;  %v1762_v4 = vpop.permute.xlu0 %1761 }
 0x287   :  { %v1660_v41 = vpop.permute.xlu1 %1659 }
 0x288   :  { %v1625_v63 = vadd.f32 %v1624_v45, %v1623_v25  ;;  %v1669_v31 = vsub.f32 %v2705_v9, %v1660_v41 }
 0x28a   :  { %v1626_v59 = vrot.slane %v1625_v63, 2  ;;  %v1677_v11 = vmul.f32 %v1669_v31, %v1669_v31  ;;  %v1802_v26 = vpop.permute.xlu0 %1801  ;;  %v1780_v31 = vsub.f32 %v2651_v51, %v1750_v2 }
 0x28b   :  { %v1684_v29 = vpop.permute.xlu1 %1683  ;;  %v2293_v53 = vpop.eup %2292 }
 0x28c   :  { %v1627_v43 = vadd.f32 %v1626_v59, %v1625_v63  ;;  %v1711_v7 = vmul.f32 %v1684_v29, %v1671_v13 }
 0x28e   :  { %v1628_v28 = vrot.slane %v1627_v43, 1  ;;  %v1720_v35 = vmul.f32 1.442695, %v1711_v7 }
 0x28f   :  { %v1692_v15 = vpop.permute.xlu1 %1691 }
 0x290   :  { %2294 = vpow2.f32 %v1720_v35  ;;  %v1713_v23 = vmul.f32 %v1692_v15, %v1673_v38  ;;  %v1629_v12 = vadd.f32 %v1628_v28, %v1627_v43  ;;  %v1770_v28 = vpop.permute.xlu0 %1769 }
 0x291   :  { %2296 = vpow2.f32 %v1722_v60 }
 0x292   :  { %v1724_v1 = vmul.f32 1.442695, %v1713_v23  ;;  %v2000_v33 = vsel %vm205_vm0, %v3614_v17, %v1629_v12 }
 0x293   :  { %v1700_v39 = vpop.permute.xlu1 %1699 }
 0x294   :  { %2298 = vpow2.f32 %v1724_v1  ;;  %v1715_v16 = vmul.f32 %v1700_v39, %v1675_v44  ;;  %v3638_v19 = vpop.permute.xlu0 %1777 }
 0x295   :  { %2300 = vpow2.f32 %v1726_v57 }
 0x296   :  { %v1728_v18 = vmul.f32 1.442695, %v1715_v16 }
 0x297   :  { %v1708_v34 = vpop.permute.xlu1 %1707 }
 0x298   :  { %2302 = vpow2.f32 %v1728_v18  ;;  %v1717_v21 = vmul.f32 %v1708_v34, %v1677_v11  ;;  %v1818_v48 = vpop.permute.xlu0 %1817  ;;  %v1788_v34 = vmul.f32 %v1780_v31, %v1780_v31 }
 0x299   :  { %2304 = vpow2.f32 %v1730_v20 }
 0x29a   :  { %v2295_v10 = vpop.eup %2294  ;;  %v1732_v8 = vmul.f32 1.442695, %v1717_v21  ;;  %v1783_v21 = vsub.f32 %v2673_v58, %v1762_v4 }
 0x29b   :  { %v2297_v50 = vpop.eup %2296  ;;  %v1734_v46 = vadd.f32 %v2295_v10, %v2293_v53 }
 0x29c   :  { %2306 = vpow2.f32 %v1732_v8  ;;  %v1754_v6 = vpop.permute.xlu1 %1753  ;;  %v1872_v23 = vpop.permute.xlu0 %1871 }
 0x29d   :  { %v1735_v32 = vadd.f32 %v2297_v50, %v1734_v46  ;;  %v1899_v57 = vsub.f32 %v2659_v54, %v1872_v23  ;;  %v1781_v40 = vsub.f32 %v2659_v54, %v1754_v6 }
 0x29e   :  { %v2299_v17 = vpop.eup %2298 }
 0x29f   :  { %v1736_v55 = vadd.f32 %v2299_v17, %v1735_v32  ;;  %v2301_v27 = vpop.eup %2300  ;;  %v1907_v1 = vmul.f32 %v1899_v57, %v1899_v57  ;;  %v1789_v39 = vmul.f32 %v1781_v40, %v1781_v40 }
 0x2a0   :  { %v1758_v3 = vpop.permute.xlu1 %1757 }
 0x2a1   :  { %v1737_v52 = vadd.f32 %v2301_v27, %v1736_v55  ;;  %v1782_v20 = vsub.f32 %v2667_v56, %v1758_v3  ;;  %v1829_v10 = vmul.f32 %v1802_v26, %v1789_v39  ;;  %v1791_v27 = vmul.f32 %v1783_v21, %v1783_v21 }
 0x2a2   :  { %v2303_v36 = vpop.eup %2302 }
 0x2a3   :  { %v1738_v25 = vadd.f32 %v2303_v36, %v1737_v52  ;;  %v2305_v47 = vpop.eup %2304  ;;  %v1790_v50 = vmul.f32 %v1782_v20, %v1782_v20  ;;  %v1838_v36 = vmul.f32 1.442695, %v1829_v10 }
 0x2a5   :  { %v1739_v14 = vadd.f32 %v2305_v47, %v1738_v25  ;;  %v1868_v45 = vpop.permute.xlu1 %1867 }
 0x2a6   :  { %v2307_v37 = vpop.eup %2306  ;;  %v1898_v16 = vsub.f32 %v2651_v51, %v1868_v45 }
 0x2a7   :  { %v1740_v42 = vsel %vm205_vm0, %v2307_v37, 0.0 }
 0x2a8   :  { %v1741_v41 = vadd.f32 %v1740_v42, %v1739_v14  ;;  %v1906_v8 = vmul.f32 %v1898_v16, %v1898_v16  ;;  %v1785_v42 = vsub.f32 %v2689_v0, %v1770_v28 }
 0x2a9   :  { %v1876_v24 = vpop.permute.xlu1 %1875 }
 0x2aa   :  { %v1742_v63 = vrot.slane %v1741_v41, 4  ;;  %v1900_v18 = vsub.f32 %v2667_v56, %v1876_v24  ;;  %v1793_v4 = vmul.f32 %v1785_v42, %v1785_v42 }
 0x2ac   :  { %v1743_v13 = vadd.f32 %v1742_v63, %v1741_v41  ;;  %v1908_v17 = vmul.f32 %v1900_v18, %v1900_v18 }
 0x2ae   :  { %v1744_v59 = vrot.slane %v1743_v13, 2  ;;  %v1798_v49 = vpop.permute.xlu1 %1797 }
 0x2af   :  { %v1828_v46 = vmul.f32 %v1798_v49, %v1788_v34 }
 0x2b0   :  { %v1745_v62 = vadd.f32 %v1744_v59, %v1743_v13 }
 0x2b1   :  { %v1836_v47 = vmul.f32 1.442695, %v1828_v46 }
 0x2b2   :  { %v1746_v30 = vrot.slane %v1745_v62, 1 }
 0x2b3   :  { %v1880_v29 = vpop.permute.xlu1 %1879 }
 0x2b4   :  { %v1747_v43 = vadd.f32 %v1746_v30, %v1745_v62  ;;  %v1901_v6 = vsub.f32 %v2673_v58, %v1880_v29 }
 0x2b6   :  { %v3636_v7 = vsel %vm1991_vm4, %v2000_v33, %v1747_v43  ;;  %v1920_v33 = vpop.permute.xlu0 %1919  ;;  %v1909_v14 = vmul.f32 %v1901_v6, %v1901_v6 }
 0x2b7   :  { %v1916_v60 = vpop.permute.xlu1 %1915  ;;  %v1947_v53 = vmul.f32 %v1920_v33, %v1907_v1 }
 0x2b8   :  { %v1946_v51 = vmul.f32 %v1916_v60, %v1906_v8 }
 0x2b9   :  { %v1956_v3 = vmul.f32 1.442695, %v1947_v53 }
 0x2ba   :  { %v1884_v54 = vpop.permute.xlu0 %1883  ;;  %v1954_v41 = vmul.f32 1.442695, %v1946_v51 }
 0x2bb   :  { %v1902_v56 = vsub.f32 %v2683_v61, %v1884_v54  ;;  %2308 = vpow2.f32 %v1956_v3 }
 0x2bc   :  { %v1766_v22 = vpop.permute.xlu1 %1765  ;;  %2310 = vpow2.f32 %v1838_v36 }
 0x2bd   :  { %v1784_v32 = vsub.f32 %v2683_v61, %v1766_v22  ;;  %v1910_v59 = vmul.f32 %v1902_v56, %v1902_v56  ;;  %2312 = vpow2.f32 %v1836_v47  ;;  %v1833_v22 = vmul.f32 %v1818_v48, %v1793_v4 }
 0x2be   :  { %v1928_v58 = vpop.permute.xlu0 %1927  ;;  %2314 = vpow2.f32 %v1954_v41 }
 0x2bf   :  { %v1792_v45 = vmul.f32 %v1784_v32, %v1784_v32  ;;  %v1949_v61 = vmul.f32 %v1928_v58, %v1909_v14  ;;  %v1846_v40 = vmul.f32 1.442695, %v1833_v22 }
 0x2c0   :  { %v1806_v38 = vpop.permute.xlu1 %1805 }
 0x2c1   :  { %v1830_v52 = vmul.f32 %v1806_v38, %v1790_v50  ;;  %v1960_v38 = vmul.f32 1.442695, %v1949_v61 }
 0x2c2   :  { %v1936_v28 = vpop.permute.xlu0 %1935 }
 0x2c3   :  { %v1840_v63 = vmul.f32 1.442695, %v1830_v52 }
 0x2c5   :  { %v1924_v35 = vpop.permute.xlu1 %1923  ;;  %2316 = vpow2.f32 %v1840_v63  ;;  %v2309_v1 = vpop.eup %2308 }
 0x2c6   :  { %v1948_v25 = vmul.f32 %v1924_v35, %v1908_v17  ;;  %v1787_v35 = vsub.f32 %v2705_v9, %v3638_v19  ;;  %v2311_v48 = vpop.eup %2310  ;;  %v1940_v20 = vpop.permute.xlu0 %1939 }
 0x2c8   :  { %v1958_v49 = vmul.f32 1.442695, %v1948_v25  ;;  %v1795_v33 = vmul.f32 %v1787_v35, %v1787_v35 }
 0x2ca   :  { %v1810_v15 = vpop.permute.xlu1 %1809  ;;  %2318 = vpow2.f32 %v1958_v49 }
 0x2cb   :  { %v1831_v37 = vmul.f32 %v1810_v15, %v1791_v27 }
 0x2cd   :  { %v1842_v62 = vmul.f32 1.442695, %v1831_v37 }
 0x2cf   :  { %v1888_v12 = vpop.permute.xlu1 %1887  ;;  %2320 = vpow2.f32 %v1842_v62 }
 0x2d0   :  { %v1903_v2 = vsub.f32 %v2689_v0, %v1888_v12 }
 0x2d2   :  { %v1911_v26 = vmul.f32 %v1903_v2, %v1903_v2 }
 0x2d4   :  { %v1774_v44 = vpop.permute.xlu1 %1773  ;;  %v1951_v12 = vmul.f32 %v1936_v28, %v1911_v26 }
 0x2d5   :  { %v1786_v30 = vsub.f32 %v2699_v5, %v1774_v44 }
 0x2d6   :  { %v1964_v16 = vmul.f32 1.442695, %v1951_v12 }
 0x2d7   :  { %v1794_v15 = vmul.f32 %v1786_v30, %v1786_v30 }
 0x2d8   :  { %v1814_v11 = vpop.permute.xlu1 %1813 }
 0x2d9   :  { %v1832_v13 = vmul.f32 %v1814_v11, %v1792_v45 }
 0x2db   :  { %v1844_v60 = vmul.f32 1.442695, %v1832_v13 }
 0x2dd   :  { %v1892_v55 = vpop.permute.xlu1 %1891  ;;  %2322 = vpow2.f32 %v1844_v60 }
 0x2de   :  { %v1904_v0 = vsub.f32 %v2699_v5, %v1892_v55  ;;  %2324 = vpow2.f32 %v1960_v38  ;;  %v2313_v5 = vpop.eup %2312 }
 0x2df   :  { %v2315_v18 = vpop.eup %2314  ;;  %v1852_v8 = vadd.f32 %v2313_v5, %v2311_v48 }
 0x2e0   :  { %v1912_v44 = vmul.f32 %v1904_v0, %v1904_v0  ;;  %v2317_v53 = vpop.eup %2316  ;;  %v1970_v46 = vadd.f32 %v2315_v18, %v2309_v1 }
 0x2e1   :  { %v1932_v24 = vpop.permute.xlu1 %1931  ;;  %v2319_v10 = vpop.eup %2318  ;;  %v1853_v32 = vadd.f32 %v2317_v53, %v1852_v8 }
 0x2e2   :  { %v1950_v29 = vmul.f32 %v1932_v24, %v1910_v59  ;;  %v1952_v34 = vmul.f32 %v1940_v20, %v1912_v44  ;;  %v2321_v50 = vpop.eup %2320 }
 0x2e3   :  { %v1854_v3 = vadd.f32 %v2321_v50, %v1853_v32 }
 0x2e4   :  { %v1962_v23 = vmul.f32 1.442695, %v1950_v29  ;;  %v1966_v17 = vmul.f32 1.442695, %v1952_v34 }
 0x2e5   :  { %v1896_v43 = vpop.permute.xlu1 %1895 }
 0x2e6   :  { %2326 = vpow2.f32 %v1962_v23  ;;  %v1905_v11 = vsub.f32 %v2705_v9, %v1896_v43  ;;  %v1971_v9 = vadd.f32 %v2319_v10, %v1970_v46 }
 0x2e7   :  { %2328 = vpow2.f32 %v1846_v40  ;;  %v2323_v55 = vpop.eup %2322 }
 0x2e8   :  { %v1913_v6 = vmul.f32 %v1905_v11, %v1905_v11  ;;  %v2325_v52 = vpop.eup %2324  ;;  %v1855_v25 = vadd.f32 %v2323_v55, %v1854_v3 }
 0x2e9   :  { %v1972_v47 = vadd.f32 %v2325_v52, %v1971_v9 }
 0x2ea   :  { %v1822_v57 = vpop.permute.xlu1 %1821 }
 0x2eb   :  { %v1834_v31 = vmul.f32 %v1822_v57, %v1794_v15 }
 0x2ed   :  { %v1848_v39 = vmul.f32 1.442695, %v1834_v31 }
 0x2ee   :  { %v1826_v19 = vpop.permute.xlu1 %1825 }
 0x2ef   :  { %v1835_v21 = vmul.f32 %v1826_v19, %v1795_v33  ;;  %2330 = vpow2.f32 %v1848_v39 }
 0x2f0   :  { %2332 = vpow2.f32 %v1964_v16  ;;  %v2327_v36 = vpop.eup %2326 }
 0x2f1   :  { %v1850_v54 = vmul.f32 1.442695, %v1835_v21  ;;  %v2329_v14 = vpop.eup %2328  ;;  %v1973_v37 = vadd.f32 %v2327_v36, %v1972_v47 }
 0x2f2   :  { %v1856_v42 = vadd.f32 %v2329_v14, %v1855_v25 }
 0x2f3   :  { %2334 = vpow2.f32 %v1850_v54  ;;  %v1944_v51 = vpop.permute.xlu1 %1943 }
 0x2f4   :  { %v1953_v27 = vmul.f32 %v1944_v51, %v1913_v6  ;;  %2336 = vpow2.f32 %v1966_v17 }
 0x2f6   :  { %v1968_v56 = vmul.f32 1.442695, %v1953_v27 }
 0x2f8   :  { %2338 = vpow2.f32 %v1968_v56 }
 0x2f9   :  { %v2331_v45 = vpop.eup %2330 }
 0x2fa   :  { %v2333_v41 = vpop.eup %2332  ;;  %v1857_v24 = vadd.f32 %v2331_v45, %v1856_v42 }
 0x2fb   :  { %v1974_v63 = vadd.f32 %v2333_v41, %v1973_v37 }
 0x2fd   :  { %v2335_v58 = vpop.eup %2334 }
 0x2fe   :  { %v1858_v2 = vsel %vm205_vm0, %v2335_v58, 0.0  ;;  %v2337_v59 = vpop.eup %2336 }
 0x2ff   :  { %v1859_v13 = vadd.f32 %v1858_v2, %v1857_v24  ;;  %v1975_v62 = vadd.f32 %v2337_v59, %v1974_v63 }
 0x301   :  { %v1860_v49 = vrot.slane %v1859_v13, 4 }
 0x302   :  { %v2339_v61 = vpop.eup %2338 }
 0x303   :  { %v1861_v4 = vadd.f32 %v1860_v49, %v1859_v13  ;;  %v1976_v30 = vsel %vm205_vm0, %v2339_v61, 0.0 }
 0x304   :  { %v1977_v29 = vadd.f32 %v1976_v30, %v1975_v62 }
 0x305   :  { %v1862_v43 = vrot.slane %v1861_v4, 2 }
 0x306   :  { %v1978_v26 = vrot.slane %v1977_v29, 4 }
 0x307   :  { %v1863_v60 = vadd.f32 %v1862_v43, %v1861_v4 }
 0x308   :  { %v1979_v22 = vadd.f32 %v1978_v26, %v1977_v29 }
 0x309   :  { %v1864_v28 = vrot.slane %v1863_v60, 1 }
 0x30a   :  { %v1980_v0 = vrot.slane %v1979_v22, 2 }
 0x30b   :  { %v1865_v35 = vadd.f32 %v1864_v28, %v1863_v60 }
 0x30c   :  { %v1981_v38 = vadd.f32 %v1980_v0, %v1979_v22 }
 0x30d   :  { %v2002_v12 = vsel %vm1993_vm5, %v3636_v7, %v1865_v35 }
 0x30e   :  { %v1982_v15 = vrot.slane %v1981_v38, 1 }
 0x310   :  { %v1983_v23 = vadd.f32 %v1982_v15, %v1981_v38 }
 0x312   :  { %v2003_v57 = vsel %vm1995_vm6, %v2002_v12, %v1983_v23 }
 0x313   :  { %v2005_v40 = vmul.f32 0.016666668, %v2003_v57 }
 0x315   :  { %2007 = vst [vmem:[#allocation2 + $0x8] sm:$0xff] %v2005_v40 }
 0x316   :  { %2378 = shalt.err (!%p2375_p4)
}
 0x317   :  { %s2379_s22 = scalar_lea.hbm %s3677_s3, 256 }
 0x318   :  { %p2380_p5 = scmp.ne.s32.totalorder %s3677_s3, %s2379_s22  ;;  %p2383_p6 = scmp.lt.u32.totalorder %s2379_s22, %s3677_s3 }
 0x31a   :  { %p2385_p7 = pnand %p2383_p6, %p2380_p5 }
 0x31c   :  { %2388 = shalt.err (!%p2385_p7)
}
 0x31d   :  { %s2408_s27 = smov 128   ;;  %s2409_s28 = smov 8  }
 0x31e   :  { %2019 = dma.vmem_to_hbm [thread:$0]  %s2014_s19, 256, %s3677_s3, [#allocation3], %s2408_s27, %s2408_s27, %s2409_s28  }
 0x31f   :  { %2389 = dma.done.wait [#allocation3], 256  }
 0x320   :  { %2390 = vsyncadd [#allocation3], 4294967040 }
 0x321   :  { %2023 = vsyncpa [#allocation3], 1 }

</bundles_post_ra>
